<compile_context>
chip_gen: v5e
topology: v5e:2x2
jax: 0.10.0
libtpu: 0.0.40
codegen_flags: <defaults>
</compile_context>

<pallas_src>
import functools

import jax
import jax.numpy as jnp
import numpy as np
from jax import lax
from jax.experimental import pallas as pl
from jax.experimental.pallas import tpu as pltpu


def _roll_lanes(a, shift):
    """Cyclic shift along the lane (last) axis of a 2-D tile.

    Static-shift jnp.roll lowers to two lane slices + a concat, which Mosaic keeps on
    the VPU/XLU (never the MXU) and which also runs under TPU interpret mode.  Callers
    mask the wrapped columns, so the cyclic wrap never leaks across segments.
    """
    return jnp.roll(a, shift, axis=1)


def _resblock_kernel(x_ref, w1_ref, w2_ref, e_exp_ref, e_avg_ref, e_sel_ref,
                     fc1w_ref, fc1b_ref, fc2w_ref, fc2b_ref, o_ref,
                     *, seg_len, n_seg, conv_dtype):
    """One grid step = n_seg batch elements laid out as a lane-dense (C, n_seg*L) slab."""
    x = x_ref[...]                                        # (C, slab) f32
    slab = x.shape[1]

    # Column index within each length-L segment (bitwise AND when L is a power of 2).
    col = lax.broadcasted_iota(jnp.int32, x.shape, 1)
    if (seg_len & (seg_len - 1)) == 0:
        col = col & (seg_len - 1)
    else:
        col = col % seg_len
    left_edge = col == 0
    right_edge = col == seg_len - 1

    def conv3(a, w_ref):
        # Cast BEFORE roll/mask/concat so the (3C, slab) temp is already in conv_dtype.
        # TODO(synk): on v5e (no bf16 VALU) keep the select math in f32 if it profiles hot.
        a = a.astype(conv_dtype)
        # Shifted copies + edge masks implement the zero padding of the k=3 "same" conv.
        a_m1 = jnp.where(left_edge, 0.0, _roll_lanes(a, 1))    # a[:, l-1]
        a_p1 = jnp.where(right_edge, 0.0, _roll_lanes(a, -1))  # a[:, l+1]
        a3 = jnp.concatenate([a_m1, a, a_p1], axis=0)          # (3C, slab) conv_dtype
        # Fused 3-tap conv: one (C, 3C) @ (3C, slab) MXU matmul, f32 accumulation.
        return jnp.dot(w_ref[...], a3, preferred_element_type=jnp.float32)

    h = jnp.maximum(conv3(x, w1_ref), 0.0)                # conv1 + ReLU   (f32)
    out = conv3(h, w2_ref)                                # conv2 (norm = Identity), f32

    # --- ChannelAttention statistics (no per-segment slice loop) -------------------
    # Per-segment mean: one MXU matmul against the (slab, n_seg) avg-pool matrix.
    avg = jnp.dot(out, e_avg_ref[...], preferred_element_type=jnp.float32)   # (C, n_seg)

    # Per-segment max: log2(L)-step roll+max suffix tree, masked at segment
    # boundaries; column 0 of each segment then holds the segment max, which one
    # tiny selection matmul extracts into (C, n_seg).
    tree = out
    s = 1
    while s < seg_len:
        cand = _roll_lanes(tree, -s)                       # tree[:, col + s] (wrap masked)
        tree = jnp.where(col < seg_len - s, jnp.maximum(tree, cand), tree)
        s *= 2
    mx = jnp.dot(tree, e_sel_ref[...], preferred_element_type=jnp.float32)   # (C, n_seg)

    # Shared MLP batched over all 2*n_seg stat columns (biases applied per column, so
    # summing the avg/max halves reproduces mlp(avg) + mlp(max) including 2*fc2b).
    stats = jnp.concatenate([avg, mx], axis=-1)            # (C, 2*n_seg)
    h1 = jnp.maximum(
        jnp.dot(fc1w_ref[...], stats, preferred_element_type=jnp.float32) + fc1b_ref[...],
        0.0)                                               # (H, 2*n_seg)
    mo = jnp.dot(fc2w_ref[...], h1, preferred_element_type=jnp.float32) + fc2b_ref[...]
    weight = jax.nn.sigmoid(mo[:, :n_seg] + mo[:, n_seg:])  # (C, n_seg)

    # Broadcast each segment's channel weight over its L columns with one tiny matmul
    # so the final store stays a single unmasked lane-dense write.
    w_full = jnp.dot(weight, e_exp_ref[...], preferred_element_type=jnp.float32)  # (C, slab)

    o_ref[...] = jnp.maximum(w_full * out + x, 0.0).astype(o_ref.dtype)


def _pick_batch_tile(n, seq_len, c, conv_bytes, vmem_budget_bytes=24 << 20):
    """Largest per-step batch count whose estimated VMEM footprint fits the budget.

    Prefers lane-dense slabs (nb*L multiple of 128).  Keeps >= 2 grid steps (v7x dual
    TensorCore with dimension_semantics='parallel') only when the slab stays >= 512
    lanes; otherwise takes the fewest, biggest steps (v5e/v6e single-TC preference).
    Budget is conservative w.r.t. v7x's 32 MiB scoped-VMEM default.
    """
    def fits(nb):
        slab = nb * seq_len
        per_step = (2 * 2 * c * slab * 4              # double-buffered x + out slabs (f32)
                    + 2 * 3 * c * slab * conv_bytes   # (3C, slab) conv concat temps
                    + 4 * c * slab * 4)               # h / out / roll-tree / misc live f32
        return per_step <= vmem_budget_bytes

    divisors = [d for d in range(1, n + 1) if n % d == 0]
    lane_ok = [d for d in divisors if (d * seq_len) % 128 == 0] or divisors
    fitting = [d for d in lane_ok if fits(d)] or [min(lane_ok)]
    nb = max(fitting)
    two_step = [d for d in fitting if n // d >= 2 and d * seq_len >= 512]
    if two_step:
        nb = max(two_step)
    return nb


def resblock_pallas(x, w1, w2, fc1w, fc1b, fc2w, fc2b, *, conv_dtype=jnp.bfloat16):
    """x: (N, C, L) f32; w1, w2: (C, C, 3); fc1w: (H, C); fc1b: (H,); fc2w: (C, H); fc2b: (C,)."""
    N, C, L = x.shape
    H = fc1w.shape[0]
    conv_bytes = jnp.dtype(conv_dtype).itemsize
    nb = _pick_batch_tile(N, L, C, conv_bytes)
    n_steps = N // nb
    slab = nb * L

    # (N, C, L) -> lane-dense (C, N*L); segment b of a slab is one batch element.
    x2 = jnp.transpose(x, (1, 0, 2)).reshape(C, N * L)

    # (C_out, C_in, 3) -> (C_out, 3*C_in) with tap-major blocks [k=0 | k=1 | k=2],
    # matching the in-kernel stack [a[l-1]; a[l]; a[l+1]].
    w1f = jnp.transpose(w1, (0, 2, 1)).reshape(C, 3 * C).astype(conv_dtype)
    w2f = jnp.transpose(w2, (0, 2, 1)).reshape(C, 3 * C).astype(conv_dtype)

    # Tiny pooling / selection / expansion operands (all f32).
    seg_of_col = jnp.arange(slab) // L
    e_exp = (seg_of_col[None, :] == jnp.arange(nb)[:, None]).astype(jnp.float32)    # (nb, slab)
    e_avg = e_exp.T / float(L)                                                      # (slab, nb)
    e_sel = (jnp.arange(slab)[:, None] ==
             (jnp.arange(nb) * L)[None, :]).astype(jnp.float32)                     # (slab, nb)

    fc1b2 = fc1b.reshape(H, 1).astype(jnp.float32)
    fc2b2 = fc2b.reshape(C, 1).astype(jnp.float32)

    kernel = functools.partial(_resblock_kernel,
                               seg_len=L, n_seg=nb, conv_dtype=conv_dtype)

    out2 = pl.pallas_call(
        kernel,
        out_shape=jax.ShapeDtypeStruct((C, N * L), x.dtype),
        grid_spec=pltpu.PrefetchScalarGridSpec(
            num_scalar_prefetch=0,
            grid=(n_steps,),
            in_specs=[
                pl.BlockSpec((C, slab), lambda i: (0, i)),       # x slab (lane-dense)
                pl.BlockSpec((C, 3 * C), lambda i: (0, 0)),      # fused conv1 weights
                pl.BlockSpec((C, 3 * C), lambda i: (0, 0)),      # fused conv2 weights
                pl.BlockSpec((nb, slab), lambda i: (0, 0)),      # weight-expand matrix
                pl.BlockSpec((slab, nb), lambda i: (0, 0)),      # avg-pool matrix
                pl.BlockSpec((slab, nb), lambda i: (0, 0)),      # max-select matrix
                pl.BlockSpec((H, C), lambda i: (0, 0)),          # fc1 W
                pl.BlockSpec((H, 1), lambda i: (0, 0)),          # fc1 b
                pl.BlockSpec((C, H), lambda i: (0, 0)),          # fc2 W
                pl.BlockSpec((C, 1), lambda i: (0, 0)),          # fc2 b
            ],
            out_specs=pl.BlockSpec((C, slab), lambda i: (0, i)),
        ),
        compiler_params=pltpu.CompilerParams(
            dimension_semantics=("parallel",)),
    )(x2, w1f, w2f, e_exp, e_avg, e_sel,
      fc1w.astype(jnp.float32), fc1b2, fc2w.astype(jnp.float32), fc2b2)

    return jnp.transpose(out2.reshape(C, N, L), (1, 0, 2))


def resblock_reference(x, w1, w2, fc1w, fc1b, fc2w, fc2b):
    """Pure-JAX reference mirroring the PyTorch forward."""
    conv = lambda a, w: lax.conv_general_dilated(
        a, w, window_strides=(1,), padding=((1, 1),),
        dimension_numbers=('NCH', 'OIH', 'NCH'))
    h = jax.nn.relu(conv(x, w1))
    out = conv(h, w2)
    avg = out.mean(-1)      # (N, C)
    mx = out.max(-1)        # (N, C)
    mlp = lambda v: jax.nn.relu(v @ fc1w.T + fc1b) @ fc2w.T + fc2b
    weight = jax.nn.sigmoid(mlp(avg) + mlp(mx))
    out = weight[..., None] * out
    return jax.nn.relu(out + x)


if __name__ == "__main__":
    # channels=32, ratio=16 -> hidden=2; N*L = 256 lanes -> one lane-dense grid step.
    N, C, L = 16, 32, 16
    H = C // 16

    key = jax.random.PRNGKey(0)
    kx, kw1, kw2, kf1, kf2 = jax.random.split(key, 5)
    x = jax.random.normal(kx, (N, C, L), dtype=jnp.float32)
    w1 = jax.random.normal(kw1, (C, C, 3), dtype=jnp.float32) * 0.1
    w2 = jax.random.normal(kw2, (C, C, 3), dtype=jnp.float32) * 0.1
    fc1w = jax.random.normal(kf1, (H, C), dtype=jnp.float32) * 0.1
    fc2w = jax.random.normal(kf2, (C, H), dtype=jnp.float32) * 0.1
    # The module initializes Linear biases to 0 (nn.init.constant_).
    fc1b = jnp.zeros((H,), dtype=jnp.float32)
    fc2b = jnp.zeros((C,), dtype=jnp.float32)

    ref = jax.block_until_ready(resblock_reference(x, w1, w2, fc1w, fc1b, fc2w, fc2b))

    # f32 conv-matmul path (validation): tight tolerance.
    out_f32 = jax.block_until_ready(
        resblock_pallas(x, w1, w2, fc1w, fc1b, fc2w, fc2b, conv_dtype=jnp.float32))
    np.testing.assert_allclose(np.asarray(out_f32), np.asarray(ref), rtol=1e-4, atol=1e-4)

    # Default bf16 conv-matmul path (native MXU operand dtype): relaxed tolerance.
    out_bf16 = jax.block_until_ready(
        resblock_pallas(x, w1, w2, fc1w, fc1b, fc2w, fc2b))
    np.testing.assert_allclose(np.asarray(out_bf16), np.asarray(ref), rtol=1e-1, atol=1e-1)

    print("KERNEL_OK")
</pallas_src>

<mosaic_0001>
module attributes {stable_mosaic.version = 11 : i64} {
  func.func @_resblock_kernel(%arg0: i32, %arg1: memref<32x256xf32, #tpu.memory_space<vmem>>, %arg2: memref<32x96xf32, #tpu.memory_space<vmem>>, %arg3: memref<32x96xf32, #tpu.memory_space<vmem>>, %arg4: memref<16x256xf32, #tpu.memory_space<vmem>>, %arg5: memref<256x16xf32, #tpu.memory_space<vmem>>, %arg6: memref<256x16xf32, #tpu.memory_space<vmem>>, %arg7: memref<2x32xf32, #tpu.memory_space<vmem>>, %arg8: memref<2x1xf32, #tpu.memory_space<vmem>>, %arg9: memref<32x2xf32, #tpu.memory_space<vmem>>, %arg10: memref<32x1xf32, #tpu.memory_space<vmem>>, %arg11: memref<32x256xf32, #tpu.memory_space<vmem>>) attributes {dimension_semantics = [#tpu.dimension_semantics<parallel>], iteration_bounds = array<i64: 1>, scalar_prefetch = 0 : i64, scratch_operands = 0 : i64, tpu.core_type = #tpu.core_type<tc>, window_params = [{transform_indices = @transform_0, window_bounds = array<i64: 32, 256>}, {pipeline_mode = #tpu.pipeline_mode<synchronous>, transform_indices = @transform_1, window_bounds = array<i64: 32, 96>}, {pipeline_mode = #tpu.pipeline_mode<synchronous>, transform_indices = @transform_2, window_bounds = array<i64: 32, 96>}, {pipeline_mode = #tpu.pipeline_mode<synchronous>, transform_indices = @transform_3, window_bounds = array<i64: 16, 256>}, {pipeline_mode = #tpu.pipeline_mode<synchronous>, transform_indices = @transform_4, window_bounds = array<i64: 256, 16>}, {pipeline_mode = #tpu.pipeline_mode<synchronous>, transform_indices = @transform_5, window_bounds = array<i64: 256, 16>}, {pipeline_mode = #tpu.pipeline_mode<synchronous>, transform_indices = @transform_6, window_bounds = array<i64: 2, 32>}, {pipeline_mode = #tpu.pipeline_mode<synchronous>, transform_indices = @transform_7, window_bounds = array<i64: 2, 1>}, {pipeline_mode = #tpu.pipeline_mode<synchronous>, transform_indices = @transform_8, window_bounds = array<i64: 32, 2>}, {pipeline_mode = #tpu.pipeline_mode<synchronous>, transform_indices = @transform_9, window_bounds = array<i64: 32, 1>}, {transform_indices = @transform_10, window_bounds = array<i64: 32, 256>}]} {
    %c0 = arith.constant 0 : index
    %c0_0 = arith.constant 0 : index
    %0 = vector.load %arg1[%c0, %c0_0] : memref<32x256xf32, #tpu.memory_space<vmem>>, vector<32x256xf32>
    %1 = tpu.iota {dimensions = array<i32: 1>} : vector<32x256xi32>
    %c15_i32 = arith.constant 15 : i32
    %2 = vector.broadcast %c15_i32 : i32 to vector<32x256xi32>
    %3 = arith.andi %1, %2 : vector<32x256xi32>
    %c0_i32 = arith.constant 0 : i32
    %4 = vector.broadcast %c0_i32 : i32 to vector<32x256xi32>
    %5 = arith.cmpi eq, %3, %4 : vector<32x256xi32>
    %c15_i32_1 = arith.constant 15 : i32
    %6 = vector.broadcast %c15_i32_1 : i32 to vector<32x256xi32>
    %7 = arith.cmpi eq, %3, %6 : vector<32x256xi32>
    %8 = vector.extract_strided_slice %0 {offsets = [0, 255], sizes = [32, 1], strides = [1, 1]} : vector<32x256xf32> to vector<32x1xf32>
    %9 = vector.extract_strided_slice %0 {offsets = [0, 0], sizes = [32, 255], strides = [1, 1]} : vector<32x256xf32> to vector<32x255xf32>
    %10 = tpu.concatenate %8, %9 in 1 : vector<32x1xf32>, vector<32x255xf32> -> vector<32x256xf32>
    %cst = arith.constant 0.000000e+00 : f32
    %11 = vector.broadcast %cst : f32 to vector<32x256xf32>
    %12 = arith.select %5, %11, %10 : vector<32x256xi1>, vector<32x256xf32>
    %13 = vector.extract_strided_slice %0 {offsets = [0, 1], sizes = [32, 255], strides = [1, 1]} : vector<32x256xf32> to vector<32x255xf32>
    %14 = vector.extract_strided_slice %0 {offsets = [0, 0], sizes = [32, 1], strides = [1, 1]} : vector<32x256xf32> to vector<32x1xf32>
    %15 = tpu.concatenate %13, %14 in 1 : vector<32x255xf32>, vector<32x1xf32> -> vector<32x256xf32>
    %cst_2 = arith.constant 0.000000e+00 : f32
    %16 = vector.broadcast %cst_2 : f32 to vector<32x256xf32>
    %17 = arith.select %7, %16, %15 : vector<32x256xi1>, vector<32x256xf32>
    %18 = tpu.concatenate %12, %0, %17 in 0 : vector<32x256xf32>, vector<32x256xf32>, vector<32x256xf32> -> vector<96x256xf32>
    %c0_3 = arith.constant 0 : index
    %c0_4 = arith.constant 0 : index
    %19 = vector.load %arg2[%c0_3, %c0_4] : memref<32x96xf32, #tpu.memory_space<vmem>>, vector<32x96xf32>
    %cst_5 = arith.constant dense<0.000000e+00> : vector<32x256xf32>
    %20 = tpu.matmul %19, %18, %cst_5 {dimension_numbers = #tpu.dot_dimension_numbers<[1], [0], [0], [1], [0, 0, 1, 1], [], []>} : vector<32x96xf32>, vector<96x256xf32>, vector<32x256xf32> -> vector<32x256xf32>
    %cst_6 = arith.constant 0.000000e+00 : f32
    %21 = vector.broadcast %cst_6 : f32 to vector<32x256xf32>
    %22 = arith.maximumf %20, %21 : vector<32x256xf32>
    %23 = vector.extract_strided_slice %22 {offsets = [0, 255], sizes = [32, 1], strides = [1, 1]} : vector<32x256xf32> to vector<32x1xf32>
    %24 = vector.extract_strided_slice %22 {offsets = [0, 0], sizes = [32, 255], strides = [1, 1]} : vector<32x256xf32> to vector<32x255xf32>
    %25 = tpu.concatenate %23, %24 in 1 : vector<32x1xf32>, vector<32x255xf32> -> vector<32x256xf32>
    %cst_7 = arith.constant 0.000000e+00 : f32
    %26 = vector.broadcast %cst_7 : f32 to vector<32x256xf32>
    %27 = arith.select %5, %26, %25 : vector<32x256xi1>, vector<32x256xf32>
    %28 = vector.extract_strided_slice %22 {offsets = [0, 1], sizes = [32, 255], strides = [1, 1]} : vector<32x256xf32> to vector<32x255xf32>
    %29 = vector.extract_strided_slice %22 {offsets = [0, 0], sizes = [32, 1], strides = [1, 1]} : vector<32x256xf32> to vector<32x1xf32>
    %30 = tpu.concatenate %28, %29 in 1 : vector<32x255xf32>, vector<32x1xf32> -> vector<32x256xf32>
    %cst_8 = arith.constant 0.000000e+00 : f32
    %31 = vector.broadcast %cst_8 : f32 to vector<32x256xf32>
    %32 = arith.select %7, %31, %30 : vector<32x256xi1>, vector<32x256xf32>
    %33 = tpu.concatenate %27, %22, %32 in 0 : vector<32x256xf32>, vector<32x256xf32>, vector<32x256xf32> -> vector<96x256xf32>
    %c0_9 = arith.constant 0 : index
    %c0_10 = arith.constant 0 : index
    %34 = vector.load %arg3[%c0_9, %c0_10] : memref<32x96xf32, #tpu.memory_space<vmem>>, vector<32x96xf32>
    %cst_11 = arith.constant dense<0.000000e+00> : vector<32x256xf32>
    %35 = tpu.matmul %34, %33, %cst_11 {dimension_numbers = #tpu.dot_dimension_numbers<[1], [0], [0], [1], [0, 0, 1, 1], [], []>} : vector<32x96xf32>, vector<96x256xf32>, vector<32x256xf32> -> vector<32x256xf32>
    %c0_12 = arith.constant 0 : index
    %c0_13 = arith.constant 0 : index
    %36 = vector.load %arg5[%c0_12, %c0_13] : memref<256x16xf32, #tpu.memory_space<vmem>>, vector<256x16xf32>
    %cst_14 = arith.constant dense<0.000000e+00> : vector<32x16xf32>
    %37 = tpu.matmul %35, %36, %cst_14 {dimension_numbers = #tpu.dot_dimension_numbers<[1], [0], [0], [1], [0, 0, 1, 1], [], []>} : vector<32x256xf32>, vector<256x16xf32>, vector<32x16xf32> -> vector<32x16xf32>
    %38 = vector.extract_strided_slice %35 {offsets = [0, 1], sizes = [32, 255], strides = [1, 1]} : vector<32x256xf32> to vector<32x255xf32>
    %39 = vector.extract_strided_slice %35 {offsets = [0, 0], sizes = [32, 1], strides = [1, 1]} : vector<32x256xf32> to vector<32x1xf32>
    %40 = tpu.concatenate %38, %39 in 1 : vector<32x255xf32>, vector<32x1xf32> -> vector<32x256xf32>
    %c15_i32_15 = arith.constant 15 : i32
    %41 = vector.broadcast %c15_i32_15 : i32 to vector<32x256xi32>
    %42 = arith.cmpi slt, %3, %41 : vector<32x256xi32>
    %43 = arith.maximumf %35, %40 : vector<32x256xf32>
    %44 = arith.select %42, %43, %35 : vector<32x256xi1>, vector<32x256xf32>
    %45 = vector.extract_strided_slice %44 {offsets = [0, 2], sizes = [32, 254], strides = [1, 1]} : vector<32x256xf32> to vector<32x254xf32>
    %46 = vector.extract_strided_slice %44 {offsets = [0, 0], sizes = [32, 2], strides = [1, 1]} : vector<32x256xf32> to vector<32x2xf32>
    %47 = tpu.concatenate %45, %46 in 1 : vector<32x254xf32>, vector<32x2xf32> -> vector<32x256xf32>
    %c14_i32 = arith.constant 14 : i32
    %48 = vector.broadcast %c14_i32 : i32 to vector<32x256xi32>
    %49 = arith.cmpi slt, %3, %48 : vector<32x256xi32>
    %50 = arith.maximumf %44, %47 : vector<32x256xf32>
    %51 = arith.select %49, %50, %44 : vector<32x256xi1>, vector<32x256xf32>
    %52 = vector.extract_strided_slice %51 {offsets = [0, 4], sizes = [32, 252], strides = [1, 1]} : vector<32x256xf32> to vector<32x252xf32>
    %53 = vector.extract_strided_slice %51 {offsets = [0, 0], sizes = [32, 4], strides = [1, 1]} : vector<32x256xf32> to vector<32x4xf32>
    %54 = tpu.concatenate %52, %53 in 1 : vector<32x252xf32>, vector<32x4xf32> -> vector<32x256xf32>
    %c12_i32 = arith.constant 12 : i32
    %55 = vector.broadcast %c12_i32 : i32 to vector<32x256xi32>
    %56 = arith.cmpi slt, %3, %55 : vector<32x256xi32>
    %57 = arith.maximumf %51, %54 : vector<32x256xf32>
    %58 = arith.select %56, %57, %51 : vector<32x256xi1>, vector<32x256xf32>
    %59 = vector.extract_strided_slice %58 {offsets = [0, 8], sizes = [32, 248], strides = [1, 1]} : vector<32x256xf32> to vector<32x248xf32>
    %60 = vector.extract_strided_slice %58 {offsets = [0, 0], sizes = [32, 8], strides = [1, 1]} : vector<32x256xf32> to vector<32x8xf32>
    %61 = tpu.concatenate %59, %60 in 1 : vector<32x248xf32>, vector<32x8xf32> -> vector<32x256xf32>
    %c8_i32 = arith.constant 8 : i32
    %62 = vector.broadcast %c8_i32 : i32 to vector<32x256xi32>
    %63 = arith.cmpi slt, %3, %62 : vector<32x256xi32>
    %64 = arith.maximumf %58, %61 : vector<32x256xf32>
    %65 = arith.select %63, %64, %58 : vector<32x256xi1>, vector<32x256xf32>
    %c0_16 = arith.constant 0 : index
    %c0_17 = arith.constant 0 : index
    %66 = vector.load %arg6[%c0_16, %c0_17] : memref<256x16xf32, #tpu.memory_space<vmem>>, vector<256x16xf32>
    %cst_18 = arith.constant dense<0.000000e+00> : vector<32x16xf32>
    %67 = tpu.matmul %65, %66, %cst_18 {dimension_numbers = #tpu.dot_dimension_numbers<[1], [0], [0], [1], [0, 0, 1, 1], [], []>} : vector<32x256xf32>, vector<256x16xf32>, vector<32x16xf32> -> vector<32x16xf32>
    %68 = tpu.concatenate %37, %67 in 1 : vector<32x16xf32>, vector<32x16xf32> -> vector<32x32xf32>
    %c0_19 = arith.constant 0 : index
    %c0_20 = arith.constant 0 : index
    %69 = vector.load %arg7[%c0_19, %c0_20] : memref<2x32xf32, #tpu.memory_space<vmem>>, vector<2x32xf32>
    %cst_21 = arith.constant dense<0.000000e+00> : vector<2x32xf32>
    %70 = tpu.matmul %69, %68, %cst_21 {dimension_numbers = #tpu.dot_dimension_numbers<[1], [0], [0], [1], [0, 0, 1, 1], [], []>} : vector<2x32xf32>, vector<32x32xf32>, vector<2x32xf32> -> vector<2x32xf32>
    %c0_22 = arith.constant 0 : index
    %c0_23 = arith.constant 0 : index
    %71 = vector.load %arg8[%c0_22, %c0_23] : memref<2x1xf32, #tpu.memory_space<vmem>>, vector<2x1xf32>
    %72 = vector.broadcast %71 : vector<2x1xf32> to vector<2x32xf32>
    %73 = arith.addf %70, %72 : vector<2x32xf32>
    %cst_24 = arith.constant 0.000000e+00 : f32
    %74 = vector.broadcast %cst_24 : f32 to vector<2x32xf32>
    %75 = arith.maximumf %73, %74 : vector<2x32xf32>
    %c0_25 = arith.constant 0 : index
    %c0_26 = arith.constant 0 : index
    %76 = vector.load %arg9[%c0_25, %c0_26] : memref<32x2xf32, #tpu.memory_space<vmem>>, vector<32x2xf32>
    %cst_27 = arith.constant dense<0.000000e+00> : vector<32x32xf32>
    %77 = tpu.matmul %76, %75, %cst_27 {dimension_numbers = #tpu.dot_dimension_numbers<[1], [0], [0], [1], [0, 0, 1, 1], [], []>} : vector<32x2xf32>, vector<2x32xf32>, vector<32x32xf32> -> vector<32x32xf32>
    %c0_28 = arith.constant 0 : index
    %c0_29 = arith.constant 0 : index
    %78 = vector.load %arg10[%c0_28, %c0_29] : memref<32x1xf32, #tpu.memory_space<vmem>>, vector<32x1xf32>
    %79 = vector.broadcast %78 : vector<32x1xf32> to vector<32x32xf32>
    %80 = arith.addf %77, %79 : vector<32x32xf32>
    %81 = vector.extract_strided_slice %80 {offsets = [0, 0], sizes = [32, 16], strides = [1, 1]} : vector<32x32xf32> to vector<32x16xf32>
    %82 = vector.extract_strided_slice %80 {offsets = [0, 16], sizes = [32, 16], strides = [1, 1]} : vector<32x32xf32> to vector<32x16xf32>
    %83 = arith.addf %81, %82 : vector<32x16xf32>
    %84 = arith.negf %83 : vector<32x16xf32>
    %85 = math.exp %84 : vector<32x16xf32>
    %cst_30 = arith.constant 1.000000e+00 : f32
    %86 = vector.broadcast %cst_30 : f32 to vector<32x16xf32>
    %87 = arith.addf %86, %85 : vector<32x16xf32>
    %88 = arith.divf %86, %87 : vector<32x16xf32>
    %c0_31 = arith.constant 0 : index
    %c0_32 = arith.constant 0 : index
    %89 = vector.load %arg4[%c0_31, %c0_32] : memref<16x256xf32, #tpu.memory_space<vmem>>, vector<16x256xf32>
    %cst_33 = arith.constant dense<0.000000e+00> : vector<32x256xf32>
    %90 = tpu.matmul %88, %89, %cst_33 {dimension_numbers = #tpu.dot_dimension_numbers<[1], [0], [0], [1], [0, 0, 1, 1], [], []>} : vector<32x16xf32>, vector<16x256xf32>, vector<32x256xf32> -> vector<32x256xf32>
    %91 = arith.mulf %90, %35 : vector<32x256xf32>
    %92 = arith.addf %91, %0 : vector<32x256xf32>
    %cst_34 = arith.constant 0.000000e+00 : f32
    %93 = vector.broadcast %cst_34 : f32 to vector<32x256xf32>
    %94 = arith.maximumf %92, %93 : vector<32x256xf32>
    %c0_35 = arith.constant 0 : index
    %c0_36 = arith.constant 0 : index
    %95 = vector.load %arg11[%c0_35, %c0_36] : memref<32x256xf32, #tpu.memory_space<vmem>>, vector<32x256xf32>
    tpu.vector_store %arg11[%c0_35, %c0_36], %94 {strides = array<i32>} : memref<32x256xf32, #tpu.memory_space<vmem>>, vector<32x256xf32>,
    return
  }
  func.func @transform_0(%arg0: i32) -> (i32, i32) {
    %c0_i32 = arith.constant 0 : i32
    %c0_i32_0 = arith.constant 0 : i32
    return %c0_i32, %arg0 : i32, i32
  }
  func.func @transform_1(%arg0: i32) -> (i32, i32) {
    %c0_i32 = arith.constant 0 : i32
    %c0_i32_0 = arith.constant 0 : i32
    %c0_i32_1 = arith.constant 0 : i32
    return %c0_i32, %c0_i32_0 : i32, i32
  }
  func.func @transform_2(%arg0: i32) -> (i32, i32) {
    %c0_i32 = arith.constant 0 : i32
    %c0_i32_0 = arith.constant 0 : i32
    %c0_i32_1 = arith.constant 0 : i32
    return %c0_i32, %c0_i32_0 : i32, i32
  }
  func.func @transform_3(%arg0: i32) -> (i32, i32) {
    %c0_i32 = arith.constant 0 : i32
    %c0_i32_0 = arith.constant 0 : i32
    %c0_i32_1 = arith.constant 0 : i32
    return %c0_i32, %c0_i32_0 : i32, i32
  }
  func.func @transform_4(%arg0: i32) -> (i32, i32) {
    %c0_i32 = arith.constant 0 : i32
    %c0_i32_0 = arith.constant 0 : i32
    %c0_i32_1 = arith.constant 0 : i32
    return %c0_i32, %c0_i32_0 : i32, i32
  }
  func.func @transform_5(%arg0: i32) -> (i32, i32) {
    %c0_i32 = arith.constant 0 : i32
    %c0_i32_0 = arith.constant 0 : i32
    %c0_i32_1 = arith.constant 0 : i32
    return %c0_i32, %c0_i32_0 : i32, i32
  }
  func.func @transform_6(%arg0: i32) -> (i32, i32) {
    %c0_i32 = arith.constant 0 : i32
    %c0_i32_0 = arith.constant 0 : i32
    %c0_i32_1 = arith.constant 0 : i32
    return %c0_i32, %c0_i32_0 : i32, i32
  }
  func.func @transform_7(%arg0: i32) -> (i32, i32) {
    %c0_i32 = arith.constant 0 : i32
    %c0_i32_0 = arith.constant 0 : i32
    %c0_i32_1 = arith.constant 0 : i32
    return %c0_i32, %c0_i32_0 : i32, i32
  }
  func.func @transform_8(%arg0: i32) -> (i32, i32) {
    %c0_i32 = arith.constant 0 : i32
    %c0_i32_0 = arith.constant 0 : i32
    %c0_i32_1 = arith.constant 0 : i32
    return %c0_i32, %c0_i32_0 : i32, i32
  }
  func.func @transform_9(%arg0: i32) -> (i32, i32) {
    %c0_i32 = arith.constant 0 : i32
    %c0_i32_0 = arith.constant 0 : i32
    %c0_i32_1 = arith.constant 0 : i32
    return %c0_i32, %c0_i32_0 : i32, i32
  }
  func.func @transform_10(%arg0: i32) -> (i32, i32) {
    %c0_i32 = arith.constant 0 : i32
    %c0_i32_0 = arith.constant 0 : i32
    return %c0_i32, %arg0 : i32, i32
  }
}

</mosaic_0001>

<bundles_post_ra>
// kernel: tpu_custom_call.1
= control target key start
LH: loop header
LB: loop body
LE: loop exit
PB: predicated region body
PF: predicated region fallthrough
CT: control target
= control target key end

     0   :  { %s1437_s17 = smov 127   ;;  %s2209_s0 = inlined_call_operand.vmem [shape: f32[32,256], index: 0, kind: input, shape index: {}]   ;;  %s2210_s1 = inlined_call_operand.vmem [shape: f32[32,96], index: 1, kind: input, shape index: {}]   ;;  %s2211_s2 = inlined_call_operand.vmem [shape: f32[32,96], index: 2, kind: input, shape index: {}]   ;;  %s2212_s3 = inlined_call_operand.vmem [shape: f32[16,256], index: 3, kind: input, shape index: {}]   ;;  %s2213_s4 = inlined_call_operand.vmem [shape: f32[256,16], index: 4, kind: input, shape index: {}]   ;;  %s2214_s5 = inlined_call_operand.vmem [shape: f32[256,16], index: 5, kind: input, shape index: {}]   ;;  %s2215_s6 = inlined_call_operand.vmem [shape: f32[2,32], index: 6, kind: input, shape index: {}]   ;;  %s2216_s7 = inlined_call_operand.vmem [shape: f32[2,1], index: 7, kind: input, shape index: {}]   ;;  %s2217_s8 = inlined_call_operand.vmem [shape: f32[32,2], index: 8, kind: input, shape index: {}]   ;;  %s2218_s9 = inlined_call_operand.vmem [shape: f32[32,1], index: 9, kind: input, shape index: {}]   ;;  %s2219_s10 = inlined_call_operand.hbm [shape: f32[32,256], index: 10, kind: output, shape index: {}]  }
   0x1   :  { %v42_v0 = vld [vmem:[%s2209_s0 + $0x30] sm:$0xff]  ;;  %v40_v1 = vld [vmem:[%s2209_s0 + $0x20] sm:$0xff] }
   0x2   :  { %118 = vrot.lane.b32.xlu0 %v42_v0, %s1437_s17  ;;  %114 = vrot.lane.b32.xlu1 %v40_v1, %s1437_s17  ;;  %v38_v2 = vld [vmem:[%s2209_s0 + $0x10] sm:$0xff] }
   0x3   :  { %110 = vrot.lane.b32.xlu2 %v38_v2, %s1437_s17 }
   0x4   :  { %15 = vsyncpa [#allocation3], 0  ;;  %v43_v3 = vld [vmem:[%s2209_s0 + $0x38] sm:$0xff]  ;;  %v41_v4 = vld [vmem:[%s2209_s0 + $0x28] sm:$0xff]  ;;  %s1438_s30 = smov 1   ;;  %v44_v8 = vlaneseq  ;;  %vm122_vm0 = vcmask 1039360  }
   0x5   :  { %v39_v5 = vld [vmem:[%s2209_s0 + $0x18] sm:$0xff]  ;;  %v37_v6 = vld [vmem:[%s2209_s0 + $0x8] sm:$0xff]  ;;  %v36_v7 = vld [vmem:[%s2209_s0] sm:$0xff]  ;;  %vm81_vm3 = vcmask 7168   ;;  %vm155_vm6 = vcmask 785408   ;;  %vm580_vm9 = vcmask 1031168  }
   0x6   :  { %v45_v10 = vand.u32 127, %v44_v8  ;;  %v151_v43 = vld [vmem:[%s2210_s1] sm:$0xff]  ;;  %v152_v46 = vld [vmem:[%s2210_s1 + $0x8] sm:$0xff]  ;;  %v153_v47 = vld [vmem:[%s2210_s1 + $0x10] sm:$0xff]  ;;  %vm643_vm12 = vcmask 1014784   ;;  %vm706_vm15 = vcmask 982016  }
   0x7   :  { %v154_v48 = vld [vmem:[%s2210_s1 + $0x18] sm:$0xff]  ;;  %s1444_s24 = smov 112   ;;  %s1445_s19 = smov [#allocation2]  }
   0x8   :  { %v46_v11 = vadd.s32 128, %v45_v10  ;;  %v1542_v14 = vand.u32 15, %v45_v10  ;;  %s1168_s1 = sshll.u32 %s1445_s19, 4  ;;  %s1170_s25 = sshll.u32 %s2219_s10, 4  ;;  %s1169_s1 = int_to_ptr.vmem [resolvable:$true] %s1168_s1  ;;  %s1171_s25 = int_to_ptr.hbm [resolvable:$true] %s1170_s25 }
   0xa   :  { %120 = vrot.lane.b32.xlu0 %v43_v3, %s1437_s17  ;;  %116 = vrot.lane.b32.xlu1 %v41_v4, %s1437_s17  ;;  %v1544_v15 = vand.u32 15, %v46_v11  ;;  %vm1280_vm1 = vcmp.ne.s32.totalorder %v1542_v14, 15  ;;  %vm1281_vm4 = vcmp.ne.s32.totalorder %v1542_v14, 0  ;;  %vm538_vm7 = vcmp.lt.s32.totalorder %v1542_v14, 15 }
   0xb   :  { %112 = vrot.lane.b32.xlu2 %v39_v5, %s1437_s17  ;;  %vm601_vm10 = vcmp.lt.s32.totalorder %v1542_v14, 14  ;;  %vm664_vm13 = vcmp.lt.s32.totalorder %v1542_v14, 12 }
   0xc   :  { %vm1282_vm2 = vcmp.ne.s32.totalorder %v1544_v15, 15  ;;  %vm1283_vm5 = vcmp.ne.s32.totalorder %v1544_v15, 0  ;;  %vm539_vm8 = vcmp.lt.s32.totalorder %v1544_v15, 15  ;;  %vm602_vm11 = vcmp.lt.s32.totalorder %v1544_v15, 14 }
   0xd   :  { %vm665_vm14 = vcmp.lt.s32.totalorder %v1544_v15, 12 }
  0x12   :  { %108 = vrot.lane.b32.xlu1 %v37_v6, %s1437_s17  ;;  %106 = vrot.lane.b32.xlu0 %v36_v7, %s1437_s17 }
  0x13   :  { %63 = vrot.lane.b32.xlu2 %v43_v3, %s1438_s30 }
  0x1a   :  { %61 = vrot.lane.b32.xlu1 %v41_v4, %s1438_s30  ;;  %79 = vrot.lane.b32.xlu0 %v42_v0, %s1438_s30 }
  0x1b   :  { %77 = vrot.lane.b32.xlu2 %v40_v1, %s1438_s30 }
  0x22   :  { %75 = vrot.lane.b32.xlu1 %v38_v2, %s1438_s30  ;;  %59 = vrot.lane.b32.xlu0 %v39_v5, %s1438_s30 }
  0x23   :  { %57 = vrot.lane.b32.xlu2 %v37_v6, %s1438_s30 }
  0x2a   :  { %73 = vrot.lane.b32.xlu0 %v36_v7, %s1438_s30 }
  0x5d   :  { %v111_v9 = vpop.permute.xlu2 %110 }
  0x65   :  { %v113_v16 = vpop.permute.xlu2 %112 }
  0x66   :  { %v124_v23 = vsel %vm122_vm0, %v111_v9, %v113_v16  ;;  %v140_v24 = vsel %vm122_vm0, %v113_v16, %v111_v9 }
  0x6d   :  { %v64_v25 = vpop.permute.xlu2 %63 }
  0x74   :  { %v119_v12 = vpop.permute.xlu0 %118  ;;  %v115_v13 = vpop.permute.xlu1 %114 }
  0x75   :  { %v78_v30 = vpop.permute.xlu2 %77 }
  0x7c   :  { %v121_v17 = vpop.permute.xlu0 %120  ;;  %v117_v18 = vpop.permute.xlu1 %116 }
  0x7d   :  { %v126_v19 = vsel %vm122_vm0, %v119_v12, %v121_v17  ;;  %v142_v20 = vsel %vm122_vm0, %v121_v17, %v119_v12  ;;  %v125_v21 = vsel %vm122_vm0, %v115_v13, %v117_v18  ;;  %v141_v22 = vsel %vm122_vm0, %v117_v18, %v115_v13  ;;  %v58_v41 = vpop.permute.xlu2 %57 }
  0x7e   :  { %1183 = vmatpush.msk.msra.mxu0 %vm1280_vm1, %v126_v19  ;;  %1203 = vmatpush.msk.msra.mxu1 %vm1282_vm2, %v142_v20 }
  0x80   :  { %1185 = vmatpush.msk.msra.mxu0 %vm1280_vm1, %v125_v21  ;;  %1205 = vmatpush.msk.msra.mxu1 %vm1282_vm2, %v141_v22 }
  0x82   :  { %1187 = vmatpush.msk.msra.mxu0 %vm1280_vm1, %v124_v23  ;;  %1207 = vmatpush.msk.msra.mxu1 %vm1282_vm2, %v140_v24 }
  0x84   :  { %v109_v26 = vpop.permute.xlu1 %108  ;;  %v107_v27 = vpop.permute.xlu0 %106 }
  0x85   :  { %v123_v28 = vsel %vm122_vm0, %v107_v27, %v109_v26  ;;  %v139_v29 = vsel %vm122_vm0, %v109_v26, %v107_v27 }
  0x86   :  { %1189 = vmatpush.msk.msra.mxu0 %vm1280_vm1, %v123_v28  ;;  %1209 = vmatpush.msk.msra.mxu1 %vm1282_vm2, %v139_v29  ;;  %v419_v28 = vld [vmem:[%s2213_s4 + $0x78] sm:$0xff] }
  0x87   :  { %v435_v29 = vld [vmem:[%s2213_s4 + $0xf8] sm:$0xff] }
  0x88   :  { %176 = vmatpush.msra.mxu0 %v42_v0  ;;  %205 = vmatpush.msra.mxu1 %v43_v3 }
  0x8a   :  { %177 = vmatpush.msra.mxu0 %v40_v1  ;;  %206 = vmatpush.msra.mxu1 %v41_v4 }
  0x8c   :  { %v62_v31 = vpop.permute.xlu1 %61  ;;  %178 = vmatpush.msra.mxu0 %v38_v2  ;;  %207 = vmatpush.msra.mxu1 %v39_v5  ;;  %v80_v32 = vpop.permute.xlu0 %79 }
  0x8d   :  { %v97_v33 = vsel %vm81_vm3, %v64_v25, %v80_v32  ;;  %v85_v34 = vsel %vm81_vm3, %v80_v32, %v64_v25  ;;  %v96_v35 = vsel %vm81_vm3, %v62_v31, %v78_v30  ;;  %v84_v36 = vsel %vm81_vm3, %v78_v30, %v62_v31  ;;  %v418_v31 = vld [vmem:[%s2213_s4 + $0x70] sm:$0xff] }
  0x8e   :  { %179 = vmatpush.msra.mxu0 %v36_v7  ;;  %208 = vmatpush.msra.mxu1 %v37_v6  ;;  %v434_v32 = vld [vmem:[%s2213_s4 + $0xf0] sm:$0xff] }
  0x90   :  { %1191 = vmatpush.msk.msra.mxu0 %vm1281_vm4, %v97_v33  ;;  %1211 = vmatpush.msk.msra.mxu1 %vm1283_vm5, %v85_v34 }
  0x92   :  { %1193 = vmatpush.msk.msra.mxu0 %vm1281_vm4, %v96_v35  ;;  %1213 = vmatpush.msk.msra.mxu1 %vm1283_vm5, %v84_v36  ;;  %v417_v35 = vld [vmem:[%s2213_s4 + $0x68] sm:$0xff] }
  0x93   :  { %v433_v36 = vld [vmem:[%s2213_s4 + $0xe8] sm:$0xff] }
  0x94   :  { %v76_v37 = vpop.permute.xlu1 %75  ;;  %v60_v38 = vpop.permute.xlu0 %59 }
  0x95   :  { %v95_v39 = vsel %vm81_vm3, %v60_v38, %v76_v37  ;;  %v83_v40 = vsel %vm81_vm3, %v76_v37, %v60_v38 }
  0x96   :  { %1195 = vmatpush.msk.msra.mxu0 %vm1281_vm4, %v95_v39  ;;  %1215 = vmatpush.msk.msra.mxu1 %vm1283_vm5, %v83_v40  ;;  %v330_v39 = vld [vmem:[%s2211_s2] sm:$0xff] }
  0x9c   :  { %v74_v42 = vpop.permute.xlu0 %73 }
  0x9d   :  { %v94_v44 = vsel %vm81_vm3, %v58_v41, %v74_v42  ;;  %v82_v45 = vsel %vm81_vm3, %v74_v42, %v58_v41  ;;  %v416_v42 = vld [vmem:[%s2213_s4 + $0x60] sm:$0xff] }
  0x9e   :  { %1197 = vmatpush.msk.msra.mxu0 %vm1281_vm4, %v94_v44  ;;  %1217 = vmatpush.msk.msra.mxu1 %vm1283_vm5, %v82_v45  ;;  %v415_v44 = vld [vmem:[%s2213_s4 + $0x58] sm:$0xff] }
  0x9f   :  { %1198 = vmatmul.msk.f32.vlgmr.msra.gmra.mxu0 %vm155_vm6, %v151_v43  ;;  %1218 = vmatmul.msk.f32.vlgmr.msra.gmra.mxu1 %vm155_vm6, %v151_v43  ;;  %v432_v43 = vld [vmem:[%s2213_s4 + $0xe0] sm:$0xff]  ;;  %v431_v45 = vld [vmem:[%s2213_s4 + $0xd8] sm:$0xff] }
  0xa0   :  { %436 = vmatpush.msrb.mxu0 %v419_v28  ;;  %465 = vmatpush.msrb.mxu1 %v435_v29 }
  0xa2   :  { %437 = vmatpush.msrb.mxu0 %v418_v31  ;;  %466 = vmatpush.msrb.mxu1 %v434_v32 }
  0xa4   :  { %438 = vmatpush.msrb.mxu0 %v417_v35  ;;  %467 = vmatpush.msrb.mxu1 %v433_v36 }
  0xa6   :  { %439 = vmatpush.msrb.mxu0 %v416_v42  ;;  %468 = vmatpush.msrb.mxu1 %v432_v43 }
  0xa7   :  { %1199 = vmatmul.msk.f32.gmra.mxu0 %vm155_vm6, %v152_v46  ;;  %1219 = vmatmul.msk.f32.gmra.mxu1 %vm155_vm6, %v152_v46  ;;  %v414_v46 = vld [vmem:[%s2213_s4 + $0x50] sm:$0xff] }
  0xa8   :  { %440 = vmatpush.msrb.mxu0 %v415_v44  ;;  %469 = vmatpush.msrb.mxu1 %v431_v45 }
  0xaa   :  { %441 = vmatpush.msrb.mxu0 %v414_v46 }
  0xaf   :  { %1200 = vmatmul.msk.f32.gmra.mxu0 %vm155_vm6, %v153_v47  ;;  %1220 = vmatmul.msk.f32.gmra.mxu1 %vm155_vm6, %v153_v47  ;;  %v430_v47 = vld [vmem:[%s2213_s4 + $0xd0] sm:$0xff] }
  0xb0   :  { %470 = vmatpush.msrb.mxu1 %v430_v47 }
  0xb7   :  { %1201 = vmatmul.msk.f32.gmra.mxu0 %vm155_vm6, %v154_v48  ;;  %1221 = vmatmul.msk.f32.gmra.mxu1 %vm155_vm6, %v154_v48  ;;  %v413_v48 = vld [vmem:[%s2213_s4 + $0x48] sm:$0xff] }
  0xb8   :  { %442 = vmatpush.msrb.mxu0 %v413_v48 }
 0x11c   :  { %v185_v49 = vpop.f32.mrf.mxu0  ;;  %v214_v50 = vpop.f32.mrf.mxu1 }
 0x11d   :  { %v1618_v51 = vmax.f32 %v185_v49, 0.0  ;;  %v227_v0 = vmax.f32 %v214_v50, 0.0  ;;  %v429_v49 = vld [vmem:[%s2213_s4 + $0xc8] sm:$0xff] }
 0x11e   :  { %v331_v50 = vld [vmem:[%s2211_s2 + $0x8] sm:$0xff]  ;;  %471 = vmatpush.msrb.mxu1 %v429_v49 }
 0x11f   :  { %286 = vrot.lane.b32.xlu1 %v1618_v51, %s1437_s17 }
 0x124   :  { %v188_v52 = vpop.f32.mrf.mxu0  ;;  %v217_v53 = vpop.f32.mrf.mxu1 }
 0x125   :  { %v228_v54 = vmax.f32 %v188_v52, 0.0  ;;  %v229_v55 = vmax.f32 %v217_v53, 0.0  ;;  %v428_v52 = vld [vmem:[%s2213_s4 + $0xc0] sm:$0xff]  ;;  %v411_v53 = vld [vmem:[%s2213_s4 + $0x38] sm:$0xff] }
 0x126   :  { %472 = vmatpush.msrb.mxu1 %v428_v52 }
 0x127   :  { %290 = vrot.lane.b32.xlu2 %v228_v54, %s1437_s17  ;;  %292 = vrot.lane.b32.xlu0 %v229_v55, %s1437_s17 }
 0x12c   :  { %v191_v56 = vpop.f32.mrf.mxu0  ;;  %v220_v57 = vpop.f32.mrf.mxu1 }
 0x12d   :  { %v230_v58 = vmax.f32 %v191_v56, 0.0  ;;  %v231_v59 = vmax.f32 %v220_v57, 0.0  ;;  %v426_v56 = vld [vmem:[%s2213_s4 + $0xb0] sm:$0xff]  ;;  %v409_v57 = vld [vmem:[%s2213_s4 + $0x28] sm:$0xff] }
 0x12f   :  { %294 = vrot.lane.b32.xlu0 %v230_v58, %s1437_s17  ;;  %296 = vrot.lane.b32.xlu1 %v231_v59, %s1437_s17 }
 0x134   :  { %v194_v60 = vpop.f32.mrf.mxu0  ;;  %v223_v61 = vpop.f32.mrf.mxu1 }
 0x135   :  { %v232_v62 = vmax.f32 %v194_v60, 0.0  ;;  %v233_v63 = vmax.f32 %v223_v61, 0.0  ;;  %v408_v60 = vld [vmem:[%s2213_s4 + $0x20] sm:$0xff] }
 0x136   :  { %v424_v61 = vld [vmem:[%s2213_s4 + $0xa0] sm:$0xff] }
 0x137   :  { %258 = vrot.lane.b32.xlu0 %v230_v58, %s1438_s30  ;;  %298 = vrot.lane.b32.xlu1 %v232_v62, %s1437_s17 }
 0x138   :  { %300 = vrot.lane.b32.xlu2 %v233_v63, %s1437_s17 }
 0x13f   :  { %240 = vrot.lane.b32.xlu1 %v229_v55, %s1438_s30  ;;  %244 = vrot.lane.b32.xlu0 %v233_v63, %s1438_s30 }
 0x140   :  { %288 = vrot.lane.b32.xlu2 %v227_v0, %s1437_s17 }
 0x147   :  { %260 = vrot.lane.b32.xlu1 %v232_v62, %s1438_s30  ;;  %238 = vrot.lane.b32.xlu0 %v227_v0, %s1438_s30 }
 0x148   :  { %242 = vrot.lane.b32.xlu2 %v231_v59, %s1438_s30 }
 0x14f   :  { %254 = vrot.lane.b32.xlu1 %v1618_v51, %s1438_s30 }
 0x150   :  { %256 = vrot.lane.b32.xlu2 %v228_v54, %s1438_s30  ;;  %s1441_s30 = smov 120  }
 0x181   :  { %v291_v1 = vpop.permute.xlu2 %290 }
 0x191   :  { %v287_v2 = vpop.permute.xlu1 %286 }
 0x192   :  { %v301_v4 = vpop.permute.xlu2 %300 }
 0x199   :  { %v293_v3 = vpop.permute.xlu0 %292 }
 0x19a   :  { %v289_v7 = vpop.permute.xlu2 %288  ;;  %v303_v16 = vsel %vm122_vm0, %v291_v1, %v293_v3  ;;  %v319_v17 = vsel %vm122_vm0, %v293_v3, %v291_v1  ;;  %v422_v1 = vld [vmem:[%s2213_s4 + $0x90] sm:$0xff]  ;;  %v421_v3 = vld [vmem:[%s2213_s4 + $0x88] sm:$0xff] }
 0x19b   :  { %v302_v18 = vsel %vm122_vm0, %v287_v2, %v289_v7  ;;  %v318_v19 = vsel %vm122_vm0, %v289_v7, %v287_v2  ;;  %v405_v2 = vld [vmem:[%s2213_s4 + $0x8] sm:$0xff] }
 0x1a1   :  { %v297_v5 = vpop.permute.xlu1 %296  ;;  %v295_v6 = vpop.permute.xlu0 %294 }
 0x1a2   :  { %v304_v11 = vsel %vm122_vm0, %v295_v6, %v297_v5  ;;  %v320_v12 = vsel %vm122_vm0, %v297_v5, %v295_v6  ;;  %v243_v21 = vpop.permute.xlu2 %242  ;;  %v404_v5 = vld [vmem:[%s2213_s4] sm:$0xff] }
 0x1a3   :  { %v420_v6 = vld [vmem:[%s2213_s4 + $0x80] sm:$0xff] }
 0x1a9   :  { %v299_v8 = vpop.permute.xlu1 %298  ;;  %v259_v13 = vpop.permute.xlu0 %258 }
 0x1aa   :  { %v305_v9 = vsel %vm122_vm0, %v299_v8, %v301_v4  ;;  %v321_v10 = vsel %vm122_vm0, %v301_v4, %v299_v8  ;;  %v276_v26 = vsel %vm81_vm3, %v243_v21, %v259_v13  ;;  %v264_v27 = vsel %vm81_vm3, %v259_v13, %v243_v21  ;;  %v257_v30 = vpop.permute.xlu2 %256  ;;  %v333_v4 = vld [vmem:[%s2211_s2 + $0x18] sm:$0xff] }
 0x1ab   :  { %1223 = vmatpush.msk.msra.mxu2 %vm1280_vm1, %v305_v9  ;;  %1243 = vmatpush.msk.msra.mxu3 %vm1282_vm2, %v321_v10 }
 0x1ad   :  { %1225 = vmatpush.msk.msra.mxu2 %vm1280_vm1, %v304_v11  ;;  %1245 = vmatpush.msk.msra.mxu3 %vm1282_vm2, %v320_v12 }
 0x1af   :  { %1227 = vmatpush.msk.msra.mxu2 %vm1280_vm1, %v303_v16  ;;  %1247 = vmatpush.msk.msra.mxu3 %vm1282_vm2, %v319_v17 }
 0x1b1   :  { %v241_v20 = vpop.permute.xlu1 %240  ;;  %1229 = vmatpush.msk.msra.mxu2 %vm1280_vm1, %v302_v18  ;;  %1249 = vmatpush.msk.msra.mxu3 %vm1282_vm2, %v318_v19  ;;  %v245_v22 = vpop.permute.xlu0 %244  ;;  %vm728_vm1 = vcmp.lt.s32.totalorder %v1544_v15, 8  ;;  %vm851_vm2 = vcmask 130048  }
 0x1b2   :  { %v275_v33 = vsel %vm81_vm3, %v241_v20, %v257_v30  ;;  %v263_v34 = vsel %vm81_vm3, %v257_v30, %v241_v20 }
 0x1b3   :  { %354 = vmatpush.msra.mxu2 %v232_v62  ;;  %383 = vmatpush.msra.mxu3 %v233_v63  ;;  %v407_v62 = vld [vmem:[%s2213_s4 + $0x18] sm:$0xff] }
 0x1b4   :  { %v423_v63 = vld [vmem:[%s2213_s4 + $0x98] sm:$0xff] }
 0x1b5   :  { %355 = vmatpush.msra.mxu2 %v230_v58  ;;  %384 = vmatpush.msra.mxu3 %v231_v59  ;;  %v425_v58 = vld [vmem:[%s2213_s4 + $0xa8] sm:$0xff]  ;;  %v332_v59 = vld [vmem:[%s2211_s2 + $0x10] sm:$0xff]  ;;  %s1439_s2 = smov 126  }
 0x1b7   :  { %356 = vmatpush.msra.mxu2 %v228_v54  ;;  %385 = vmatpush.msra.mxu3 %v229_v55  ;;  %v427_v54 = vld [vmem:[%s2213_s4 + $0xb8] sm:$0xff]  ;;  %v410_v55 = vld [vmem:[%s2213_s4 + $0x30] sm:$0xff] }
 0x1b8   :  { %473 = vmatpush.msrb.mxu1 %v427_v54 }
 0x1b9   :  { %v261_v23 = vpop.permute.xlu1 %260  ;;  %357 = vmatpush.msra.mxu2 %v1618_v51  ;;  %386 = vmatpush.msra.mxu3 %v227_v0  ;;  %v239_v37 = vpop.permute.xlu0 %238  ;;  %v412_v51 = vld [vmem:[%s2213_s4 + $0x40] sm:$0xff]  ;;  %v406_v0 = vld [vmem:[%s2213_s4 + $0x10] sm:$0xff]  ;;  %s1440_s4 = smov 124  }
 0x1ba   :  { %v277_v24 = vsel %vm81_vm3, %v245_v22, %v261_v23  ;;  %v265_v25 = vsel %vm81_vm3, %v261_v23, %v245_v22  ;;  %443 = vmatpush.msrb.mxu0 %v412_v51  ;;  %474 = vmatpush.msrb.mxu1 %v426_v56 }
 0x1bb   :  { %1231 = vmatpush.msk.msra.mxu2 %vm1281_vm4, %v277_v24  ;;  %1251 = vmatpush.msk.msra.mxu3 %vm1283_vm5, %v265_v25 }
 0x1bc   :  { %444 = vmatpush.msrb.mxu0 %v411_v53  ;;  %475 = vmatpush.msrb.mxu1 %v425_v58 }
 0x1bd   :  { %1233 = vmatpush.msk.msra.mxu2 %vm1281_vm4, %v276_v26  ;;  %1253 = vmatpush.msk.msra.mxu3 %vm1283_vm5, %v264_v27 }
 0x1be   :  { %445 = vmatpush.msrb.mxu0 %v410_v55  ;;  %476 = vmatpush.msrb.mxu1 %v424_v61 }
 0x1bf   :  { %1235 = vmatpush.msk.msra.mxu2 %vm1281_vm4, %v275_v33  ;;  %1255 = vmatpush.msk.msra.mxu3 %vm1283_vm5, %v263_v34 }
 0x1c0   :  { %446 = vmatpush.msrb.mxu0 %v409_v57  ;;  %477 = vmatpush.msrb.mxu1 %v423_v63 }
 0x1c1   :  { %v255_v38 = vpop.permute.xlu1 %254 }
 0x1c2   :  { %v274_v40 = vsel %vm81_vm3, %v239_v37, %v255_v38  ;;  %v262_v41 = vsel %vm81_vm3, %v255_v38, %v239_v37  ;;  %447 = vmatpush.msrb.mxu0 %v408_v60  ;;  %478 = vmatpush.msrb.mxu1 %v422_v1  ;;  %vm863_vm3 = vcmask 261120  }
 0x1c3   :  { %1237 = vmatpush.msk.msra.mxu2 %vm1281_vm4, %v274_v40  ;;  %1257 = vmatpush.msk.msra.mxu3 %vm1283_vm5, %v262_v41  ;;  %vm929_vm4 = vcmask 1041408   ;;  %vm916_vm5 = vcmask 15360  }
 0x1c4   :  { %1238 = vmatmul.msk.f32.vlgmr.msra.gmra.mxu2 %vm155_vm6, %v330_v39  ;;  %1258 = vmatmul.msk.f32.vlgmr.msra.gmra.mxu3 %vm155_vm6, %v330_v39 }
 0x1c5   :  { %448 = vmatpush.msrb.mxu0 %v407_v62  ;;  %479 = vmatpush.msrb.mxu1 %v421_v3 }
 0x1c7   :  { %449 = vmatpush.msrb.mxu0 %v406_v0  ;;  %480 = vmatpush.msrb.mxu1 %v420_v6 }
 0x1c9   :  { %450 = vmatpush.msrb.mxu0 %v405_v2 }
 0x1cb   :  { %451 = vmatpush.msrb.mxu0 %v404_v5 }
 0x1cc   :  { %1239 = vmatmul.msk.f32.gmra.mxu2 %vm155_vm6, %v331_v50  ;;  %1259 = vmatmul.msk.f32.gmra.mxu3 %vm155_vm6, %v331_v50 }
 0x1d4   :  { %1240 = vmatmul.msk.f32.gmra.mxu2 %vm155_vm6, %v332_v59  ;;  %1260 = vmatmul.msk.f32.gmra.mxu3 %vm155_vm6, %v332_v59 }
 0x1dc   :  { %1241 = vmatmul.msk.f32.gmra.mxu2 %vm155_vm6, %v333_v4  ;;  %1261 = vmatmul.msk.f32.gmra.mxu3 %vm155_vm6, %v333_v4 }
 0x247   :  { %v1803_v7 = vpop.f32.mrf.mxu2  ;;  %v1805_v8 = vpop.f32.mrf.mxu3 }
 0x248   :  { %452 = vmatmul.f32.vlgmr.msrb.gmra.mxu0 %v1803_v7  ;;  %481 = vmatmul.f32.vlgmr.msrb.gmra.mxu1 %v1805_v8  ;;  %v1294_v9 = vpack.i.bf16 %v1805_v8, %v1803_v7 }
 0x24a   :  { %1295 = vrot.lane.b32.xlu2 %v1294_v9, %s1437_s17 }
 0x24f   :  { %v1812_v10 = vpop.f32.mrf.mxu2  ;;  %v1814_v11 = vpop.f32.mrf.mxu3 }
 0x250   :  { %455 = vmatmul.f32.gmra.mxu0 %v1812_v10  ;;  %484 = vmatmul.f32.gmra.mxu1 %v1814_v11  ;;  %v1299_v12 = vpack.i.bf16 %v1814_v11, %v1812_v10 }
 0x252   :  { %1300 = vrot.lane.b32.xlu0 %v1299_v12, %s1437_s17 }
 0x257   :  { %v1821_v13 = vpop.f32.mrf.mxu2  ;;  %v1823_v16 = vpop.f32.mrf.mxu3 }
 0x258   :  { %458 = vmatmul.f32.gmra.mxu0 %v1821_v13  ;;  %487 = vmatmul.f32.gmra.mxu1 %v1823_v16  ;;  %v1304_v17 = vpack.i.bf16 %v1823_v16, %v1821_v13 }
 0x25a   :  { %1305 = vrot.lane.b32.xlu1 %v1304_v17, %s1437_s17 }
 0x25f   :  { %v1830_v18 = vpop.f32.mrf.mxu2  ;;  %v1832_v19 = vpop.f32.mrf.mxu3 }
 0x260   :  { %v1309_v20 = vpack.i.bf16 %v1832_v19, %v1830_v18  ;;  %461 = vmatmul.f32.gmra.mxu0 %v1830_v18  ;;  %490 = vmatmul.f32.gmra.mxu1 %v1832_v19 }
 0x262   :  { %1310 = vrot.lane.b32.xlu2 %v1309_v20, %s1437_s17 }
 0x2a4   :  { %v1296_v21 = vpop.permute.xlu2 %1295 }
 0x2a5   :  { %v1298_v22 = vunpack.i.h.bf16 %v1296_v21  ;;  %v1297_v23 = vunpack.i.l.bf16 %v1296_v21 }
 0x2a7   :  { %v518_v24 = vsel %vm122_vm0, %v1297_v23, %v1298_v22  ;;  %v534_v25 = vsel %vm122_vm0, %v1298_v22, %v1297_v23 }
 0x2a8   :  { %v540_v26 = vmax.f32 %v1803_v7, %v518_v24  ;;  %v541_v27 = vmax.f32 %v1805_v8, %v534_v25 }
 0x2aa   :  { %v548_v28 = vsel %vm538_vm7, %v540_v26, %v1803_v7  ;;  %v549_v29 = vsel %vm539_vm8, %v541_v27, %v1805_v8 }
 0x2ab   :  { %v1314_v30 = vpack.i.bf16 %v549_v29, %v548_v28 }
 0x2ad   :  { %1315 = vrot.lane.b32.xlu0 %v1314_v30, %s1439_s2 }
 0x2bc   :  { %v1311_v31 = vpop.permute.xlu2 %1310 }
 0x2bd   :  { %v1313_v32 = vunpack.i.h.bf16 %v1311_v31  ;;  %v1312_v33 = vunpack.i.l.bf16 %v1311_v31 }
 0x2bf   :  { %v521_v34 = vsel %vm122_vm0, %v1312_v33, %v1313_v32  ;;  %v537_v35 = vsel %vm122_vm0, %v1313_v32, %v1312_v33 }
 0x2c0   :  { %v546_v36 = vmax.f32 %v1830_v18, %v521_v34  ;;  %v547_v37 = vmax.f32 %v1832_v19, %v537_v35 }
 0x2c2   :  { %v554_v38 = vsel %vm538_vm7, %v546_v36, %v1830_v18  ;;  %v555_v39 = vsel %vm539_vm8, %v547_v37, %v1832_v19 }
 0x2c3   :  { %v1329_v40 = vpack.i.bf16 %v555_v39, %v554_v38 }
 0x2c4   :  { %v1301_v41 = vpop.permute.xlu0 %1300 }
 0x2c5   :  { %v1303_v42 = vunpack.i.h.bf16 %v1301_v41  ;;  %v1302_v43 = vunpack.i.l.bf16 %v1301_v41  ;;  %1330 = vrot.lane.b32.xlu0 %v1329_v40, %s1439_s2 }
 0x2c7   :  { %v519_v44 = vsel %vm122_vm0, %v1302_v43, %v1303_v42  ;;  %v535_v45 = vsel %vm122_vm0, %v1303_v42, %v1302_v43 }
 0x2c8   :  { %v542_v46 = vmax.f32 %v1812_v10, %v519_v44  ;;  %v543_v47 = vmax.f32 %v1814_v11, %v535_v45 }
 0x2ca   :  { %v550_v48 = vsel %vm538_vm7, %v542_v46, %v1812_v10  ;;  %v551_v49 = vsel %vm539_vm8, %v543_v47, %v1814_v11 }
 0x2cb   :  { %v1319_v50 = vpack.i.bf16 %v551_v49, %v550_v48 }
 0x2cc   :  { %v1306_v51 = vpop.permute.xlu1 %1305 }
 0x2cd   :  { %v1308_v52 = vunpack.i.h.bf16 %v1306_v51  ;;  %v1307_v53 = vunpack.i.l.bf16 %v1306_v51  ;;  %1320 = vrot.lane.b32.xlu1 %v1319_v50, %s1439_s2 }
 0x2cf   :  { %v520_v54 = vsel %vm122_vm0, %v1307_v53, %v1308_v52  ;;  %v536_v55 = vsel %vm122_vm0, %v1308_v52, %v1307_v53  ;;  %v760_v52 = vld [vmem:[%s2214_s5 + $0x78] sm:$0xff]  ;;  %vm727_vm0 = vcmp.lt.s32.totalorder %v1542_v14, 8 }
 0x2d0   :  { %v544_v56 = vmax.f32 %v1821_v13, %v520_v54  ;;  %v545_v57 = vmax.f32 %v1823_v16, %v536_v55  ;;  %v776_v53 = vld [vmem:[%s2214_s5 + $0xf8] sm:$0xff]  ;;  %777 = vmatpush.msrb.mxu2 %v760_v52 }
 0x2d1   :  { %806 = vmatpush.msrb.mxu3 %v776_v53  ;;  %v748_v53 = vld [vmem:[%s2214_s5 + $0x18] sm:$0xff] }
 0x2d2   :  { %v552_v58 = vsel %vm538_vm7, %v544_v56, %v1821_v13  ;;  %v553_v59 = vsel %vm539_vm8, %v545_v57, %v1823_v16  ;;  %v758_v56 = vld [vmem:[%s2214_s5 + $0x68] sm:$0xff] }
 0x2d3   :  { %v1324_v60 = vpack.i.bf16 %v553_v59, %v552_v58  ;;  %v774_v57 = vld [vmem:[%s2214_s5 + $0xe8] sm:$0xff] }
 0x2d5   :  { %1325 = vrot.lane.b32.xlu2 %v1324_v60, %s1439_s2  ;;  %v757_v60 = vld [vmem:[%s2214_s5 + $0x60] sm:$0xff] }
 0x31f   :  { %v1316_v61 = vpop.permute.xlu0 %1315 }
 0x320   :  { %v1318_v62 = vunpack.i.h.bf16 %v1316_v61  ;;  %v1317_v63 = vunpack.i.l.bf16 %v1316_v61  ;;  %v773_v61 = vld [vmem:[%s2214_s5 + $0xe0] sm:$0xff] }
 0x322   :  { %v581_v0 = vsel %vm580_vm9, %v1317_v63, %v1318_v62  ;;  %v597_v1 = vsel %vm580_vm9, %v1318_v62, %v1317_v63 }
 0x323   :  { %v603_v2 = vmax.f32 %v548_v28, %v581_v0  ;;  %v604_v3 = vmax.f32 %v549_v29, %v597_v1  ;;  %v756_v1 = vld [vmem:[%s2214_s5 + $0x58] sm:$0xff] }
 0x325   :  { %v611_v4 = vsel %vm601_vm10, %v603_v2, %v548_v28  ;;  %v612_v5 = vsel %vm602_vm11, %v604_v3, %v549_v29  ;;  %v772_v2 = vld [vmem:[%s2214_s5 + $0xd8] sm:$0xff] }
 0x326   :  { %v1334_v6 = vpack.i.bf16 %v612_v5, %v611_v4 }
 0x328   :  { %1335 = vrot.lane.b32.xlu1 %v1334_v6, %s1440_s4 }
 0x32f   :  { %v1326_v9 = vpop.permute.xlu2 %1325 }
 0x330   :  { %v1328_v12 = vunpack.i.h.bf16 %v1326_v9  ;;  %v1327_v17 = vunpack.i.l.bf16 %v1326_v9  ;;  %v771_v9 = vld [vmem:[%s2214_s5 + $0xd0] sm:$0xff] }
 0x332   :  { %v583_v20 = vsel %vm580_vm9, %v1327_v17, %v1328_v12  ;;  %v599_v21 = vsel %vm580_vm9, %v1328_v12, %v1327_v17 }
 0x333   :  { %v607_v22 = vmax.f32 %v552_v58, %v583_v20  ;;  %v608_v23 = vmax.f32 %v553_v59, %v599_v21  ;;  %v754_v20 = vld [vmem:[%s2214_s5 + $0x48] sm:$0xff] }
 0x334   :  { %v770_v21 = vld [vmem:[%s2214_s5 + $0xc8] sm:$0xff] }
 0x335   :  { %v1898_v24 = vsel %vm601_vm10, %v607_v22, %v552_v58  ;;  %v1902_v25 = vsel %vm602_vm11, %v608_v23, %v553_v59 }
 0x336   :  { %v1344_v26 = vpack.i.bf16 %v1902_v25, %v1898_v24 }
 0x337   :  { %v1331_v27 = vpop.permute.xlu0 %1330 }
 0x338   :  { %v1333_v28 = vunpack.i.h.bf16 %v1331_v27  ;;  %v1332_v29 = vunpack.i.l.bf16 %v1331_v27  ;;  %1345 = vrot.lane.b32.xlu0 %v1344_v26, %s1440_s4  ;;  %v753_v26 = vld [vmem:[%s2214_s5 + $0x40] sm:$0xff] }
 0x339   :  { %v769_v27 = vld [vmem:[%s2214_s5 + $0xc0] sm:$0xff] }
 0x33a   :  { %v584_v30 = vsel %vm580_vm9, %v1332_v29, %v1333_v28  ;;  %v600_v31 = vsel %vm580_vm9, %v1333_v28, %v1332_v29 }
 0x33b   :  { %v609_v32 = vmax.f32 %v554_v38, %v584_v30  ;;  %v610_v33 = vmax.f32 %v555_v39, %v600_v31  ;;  %v752_v31 = vld [vmem:[%s2214_s5 + $0x38] sm:$0xff] }
 0x33d   :  { %v1911_v34 = vsel %vm601_vm10, %v609_v32, %v554_v38  ;;  %v1915_v35 = vsel %vm602_vm11, %v610_v33, %v555_v39  ;;  %v768_v32 = vld [vmem:[%s2214_s5 + $0xb8] sm:$0xff] }
 0x33e   :  { %v1349_v36 = vpack.i.bf16 %v1915_v35, %v1911_v34 }
 0x33f   :  { %v1321_v37 = vpop.permute.xlu1 %1320 }
 0x340   :  { %v1323_v40 = vunpack.i.h.bf16 %v1321_v37  ;;  %v1322_v41 = vunpack.i.l.bf16 %v1321_v37  ;;  %1350 = vrot.lane.b32.xlu1 %v1349_v36, %s1440_s4 }
 0x342   :  { %v582_v42 = vsel %vm580_vm9, %v1322_v41, %v1323_v40  ;;  %v598_v43 = vsel %vm580_vm9, %v1323_v40, %v1322_v41  ;;  %v751_v40 = vld [vmem:[%s2214_s5 + $0x30] sm:$0xff] }
 0x343   :  { %v605_v44 = vmax.f32 %v550_v48, %v582_v42  ;;  %v606_v45 = vmax.f32 %v551_v49, %v598_v43  ;;  %v767_v41 = vld [vmem:[%s2214_s5 + $0xb0] sm:$0xff] }
 0x345   :  { %v613_v38 = vsel %vm601_vm10, %v605_v44, %v550_v48  ;;  %v614_v39 = vsel %vm602_vm11, %v606_v45, %v551_v49  ;;  %v759_v48 = vld [vmem:[%s2214_s5 + $0x70] sm:$0xff]  ;;  %v750_v44 = vld [vmem:[%s2214_s5 + $0x28] sm:$0xff] }
 0x346   :  { %v1339_v46 = vpack.i.bf16 %v614_v39, %v613_v38  ;;  %v775_v49 = vld [vmem:[%s2214_s5 + $0xf0] sm:$0xff]  ;;  %778 = vmatpush.msrb.mxu2 %v759_v48  ;;  %v766_v45 = vld [vmem:[%s2214_s5 + $0xa8] sm:$0xff]  ;;  %v764_v48 = vld [vmem:[%s2214_s5 + $0x98] sm:$0xff] }
 0x347   :  { %807 = vmatpush.msrb.mxu3 %v775_v49 }
 0x348   :  { %1340 = vrot.lane.b32.xlu2 %v1339_v46, %s1440_s4  ;;  %779 = vmatpush.msrb.mxu2 %v758_v56  ;;  %v749_v46 = vld [vmem:[%s2214_s5 + $0x20] sm:$0xff] }
 0x349   :  { %808 = vmatpush.msrb.mxu3 %v774_v57 }
 0x34a   :  { %780 = vmatpush.msrb.mxu2 %v757_v60 }
 0x34b   :  { %809 = vmatpush.msrb.mxu3 %v773_v61  ;;  %v747_v61 = vld [vmem:[%s2214_s5 + $0x10] sm:$0xff] }
 0x34c   :  { %781 = vmatpush.msrb.mxu2 %v756_v1  ;;  %v745_v1 = vld [vmem:[%s2214_s5] sm:$0xff] }
 0x34d   :  { %810 = vmatpush.msrb.mxu3 %v772_v2  ;;  %v761_v2 = vld [vmem:[%s2214_s5 + $0x80] sm:$0xff] }
 0x34f   :  { %811 = vmatpush.msrb.mxu3 %v771_v9 }
 0x351   :  { %812 = vmatpush.msrb.mxu3 %v770_v21 }
 0x353   :  { %813 = vmatpush.msrb.mxu3 %v769_v27 }
 0x355   :  { %814 = vmatpush.msrb.mxu3 %v768_v32 }
 0x357   :  { %815 = vmatpush.msrb.mxu3 %v767_v41 }
 0x359   :  { %816 = vmatpush.msrb.mxu3 %v766_v45 }
 0x39a   :  { %v1336_v47 = vpop.permute.xlu1 %1335 }
 0x39b   :  { %v1338_v50 = vunpack.i.h.bf16 %v1336_v47  ;;  %v1337_v51 = vunpack.i.l.bf16 %v1336_v47  ;;  %v765_v47 = vld [vmem:[%s2214_s5 + $0xa0] sm:$0xff] }
 0x39c   :  { %817 = vmatpush.msrb.mxu3 %v765_v47 }
 0x39d   :  { %v644_v54 = vsel %vm643_vm12, %v1337_v51, %v1338_v50  ;;  %v660_v55 = vsel %vm643_vm12, %v1338_v50, %v1337_v51 }
 0x39e   :  { %v666_v58 = vmax.f32 %v611_v4, %v644_v54  ;;  %v667_v59 = vmax.f32 %v612_v5, %v660_v55  ;;  %818 = vmatpush.msrb.mxu3 %v764_v48 }
 0x3a0   :  { %v1957_v62 = vsel %vm664_vm13, %v666_v58, %v611_v4  ;;  %v1961_v63 = vsel %vm665_vm14, %v667_v59, %v612_v5  ;;  %v755_v5 = vld [vmem:[%s2214_s5 + $0x50] sm:$0xff] }
 0x3a1   :  { %v1354_v0 = vpack.i.bf16 %v1961_v63, %v1957_v62  ;;  %782 = vmatpush.msrb.mxu2 %v755_v5 }
 0x3a2   :  { %v1341_v3 = vpop.permute.xlu2 %1340 }
 0x3a3   :  { %v1343_v4 = vunpack.i.h.bf16 %v1341_v3  ;;  %v1342_v6 = vunpack.i.l.bf16 %v1341_v3  ;;  %1355 = vrot.lane.b32.xlu2 %v1354_v0, %s1441_s30  ;;  %783 = vmatpush.msrb.mxu2 %v754_v20  ;;  %v763_v0 = vld [vmem:[%s2214_s5 + $0x90] sm:$0xff] }
 0x3a4   :  { %819 = vmatpush.msrb.mxu3 %v763_v0  ;;  %v482_v0 = vpop.f32.mrf.mxu1 }
 0x3a5   :  { %v645_v12 = vsel %vm643_vm12, %v1342_v6, %v1343_v4  ;;  %v661_v17 = vsel %vm643_vm12, %v1343_v4, %v1342_v6  ;;  %784 = vmatpush.msrb.mxu2 %v753_v26 }
 0x3a6   :  { %v668_v22 = vmax.f32 %v613_v38, %v645_v12  ;;  %v669_v23 = vmax.f32 %v614_v39, %v661_v17 }
 0x3a7   :  { %785 = vmatpush.msrb.mxu2 %v752_v31 }
 0x3a8   :  { %v1994_v28 = vsel %vm664_vm13, %v668_v22, %v613_v38  ;;  %v1998_v29 = vsel %vm665_vm14, %v669_v23, %v614_v39 }
 0x3a9   :  { %v1359_v30 = vpack.i.bf16 %v1998_v29, %v1994_v28  ;;  %786 = vmatpush.msrb.mxu2 %v751_v40 }
 0x3aa   :  { %v1346_v33 = vpop.permute.xlu0 %1345 }
 0x3ab   :  { %v1348_v36 = vunpack.i.h.bf16 %v1346_v33  ;;  %v1347_v37 = vunpack.i.l.bf16 %v1346_v33  ;;  %1360 = vrot.lane.b32.xlu0 %v1359_v30, %s1441_s30  ;;  %787 = vmatpush.msrb.mxu2 %v750_v44 }
 0x3ad   :  { %v646_v42 = vsel %vm643_vm12, %v1347_v37, %v1348_v36  ;;  %v662_v43 = vsel %vm643_vm12, %v1348_v36, %v1347_v37  ;;  %788 = vmatpush.msrb.mxu2 %v749_v46 }
 0x3ae   :  { %v670_v38 = vmax.f32 %v1898_v24, %v646_v42  ;;  %v671_v39 = vmax.f32 %v1902_v25, %v662_v43 }
 0x3af   :  { %789 = vmatpush.msrb.mxu2 %v748_v53 }
 0x3b0   :  { %v2034_v50 = vsel %vm664_vm13, %v670_v38, %v1898_v24  ;;  %v2039_v51 = vsel %vm665_vm14, %v671_v39, %v1902_v25 }
 0x3b1   :  { %v1364_v52 = vpack.i.bf16 %v2039_v51, %v2034_v50  ;;  %790 = vmatpush.msrb.mxu2 %v747_v61 }
 0x3b2   :  { %v1351_v24 = vpop.permute.xlu1 %1350 }
 0x3b3   :  { %v1353_v49 = vunpack.i.h.bf16 %v1351_v24  ;;  %v1352_v54 = vunpack.i.l.bf16 %v1351_v24  ;;  %1365 = vrot.lane.b32.xlu1 %v1364_v52, %s1441_s30 }
 0x3b5   :  { %v647_v25 = vsel %vm643_vm12, %v1352_v54, %v1353_v49  ;;  %v663_v55 = vsel %vm643_vm12, %v1353_v49, %v1352_v54 }
 0x3b6   :  { %v672_v56 = vmax.f32 %v1911_v34, %v647_v25  ;;  %v673_v57 = vmax.f32 %v1915_v35, %v663_v55 }
 0x3b8   :  { %v680_v58 = vsel %vm664_vm13, %v672_v56, %v1911_v34  ;;  %v681_v59 = vsel %vm665_vm14, %v673_v57, %v1915_v35  ;;  %v746_v34 = vld [vmem:[%s2214_s5 + $0x8] sm:$0xff] }
 0x3b9   :  { %v1369_v60 = vpack.i.bf16 %v681_v59, %v680_v58  ;;  %v762_v35 = vld [vmem:[%s2214_s5 + $0x88] sm:$0xff]  ;;  %791 = vmatpush.msrb.mxu2 %v746_v34  ;;  %s1442_s5 = smov 16   ;;  %v857_v34 = vld [vmem:[%s2216_s7] sm:$0x3] }
 0x3ba   :  { %820 = vmatpush.msrb.mxu3 %v762_v35 }
 0x3bb   :  { %1370 = vrot.lane.b32.xlu2 %v1369_v60, %s1441_s30  ;;  %792 = vmatpush.msrb.mxu2 %v745_v1  ;;  %v485_v1 = vpop.f32.mrf.mxu1 }
 0x3bc   :  { %821 = vmatpush.msrb.mxu3 %v761_v2  ;;  %v1443_v2 = vmov 0  }
 0x3bd   :  { %1384 = vset.pattern.permute.xlu2 %v1443_v2  ;;  %1385 = vset.pattern.permute.xlu0 %v1443_v2 }
 0x3be   :  { %1386 = vset.pattern.permute.xlu1 %v1443_v2 }
 0x3c3   :  { %860 = vperm.xlu2 %1384, %v857_v34  }
 0x3fd   :  { %v1356_v3 = vpop.permute.xlu2 %1355 }
 0x3fe   :  { %v1358_v4 = vunpack.i.h.bf16 %v1356_v3  ;;  %v1357_v6 = vunpack.i.l.bf16 %v1356_v3  ;;  %v894_v3 = vld [vmem:[%s2218_s9 + $0x10] sm:$0xff] }
 0x3ff   :  { %908 = vperm.xlu2 %1384, %v894_v3  }
 0x400   :  { %v707_v5 = vsel %vm706_vm15, %v1357_v6, %v1358_v4  ;;  %v723_v9 = vsel %vm706_vm15, %v1358_v4, %v1357_v6  ;;  %v488_v6 = vpop.f32.mrf.mxu1 }
 0x401   :  { %v729_v12 = vmax.f32 %v1957_v62, %v707_v5  ;;  %v730_v17 = vmax.f32 %v1961_v63, %v723_v9 }
 0x403   :  { %v737_v20 = vsel %vm727_vm0, %v729_v12, %v1957_v62  ;;  %v738_v21 = vsel %vm728_vm1, %v730_v17, %v1961_v63 }
 0x404   :  { %793 = vmatmul.f32.vlgmr.msrb.gmra.mxu2 %v737_v20  ;;  %822 = vmatmul.f32.vlgmr.msrb.gmra.mxu3 %v738_v21 }
 0x408   :  { %v491_v9 = vpop.f32.mrf.mxu1 }
 0x415   :  { %v1371_v33 = vpop.permute.xlu2 %1370 }
 0x416   :  { %v1373_v41 = vunpack.i.h.bf16 %v1371_v33  ;;  %v1372_v42 = vunpack.i.l.bf16 %v1371_v33  ;;  %v856_v33 = vld [vmem:[%s2215_s6] sm:$0x3] }
 0x418   :  { %v710_v39 = vsel %vm706_vm15, %v1372_v42, %v1373_v41  ;;  %v726_v46 = vsel %vm706_vm15, %v1373_v41, %v1372_v42  ;;  %v895_v41 = vld [vmem:[%s2218_s9 + $0x18] sm:$0xff] }
 0x419   :  { %v735_v47 = vmax.f32 %v680_v58, %v710_v39  ;;  %v736_v52 = vmax.f32 %v681_v59, %v726_v46  ;;  %v891_v39 = vld [vmem:[%s2217_s8 + $0x18] sm:$0xff] }
 0x41b   :  { %v743_v53 = vsel %vm727_vm0, %v735_v47, %v680_v58  ;;  %v744_v48 = vsel %vm728_vm1, %v736_v52, %v681_v59  ;;  %v453_v59 = vpop.f32.mrf.mxu0 }
 0x41d   :  { %v1361_v22 = vpop.permute.xlu0 %1360  ;;  %v861_v42 = vpop.permute.xlu2 %860 }
 0x41e   :  { %v1363_v23 = vunpack.i.h.bf16 %v1361_v22  ;;  %v1362_v26 = vunpack.i.l.bf16 %v1361_v22 }
 0x420   :  { %v708_v27 = vsel %vm706_vm15, %v1362_v26, %v1363_v23  ;;  %v724_v30 = vsel %vm706_vm15, %v1363_v23, %v1362_v26 }
 0x421   :  { %v731_v31 = vmax.f32 %v1994_v28, %v708_v27  ;;  %v732_v32 = vmax.f32 %v1998_v29, %v724_v30 }
 0x423   :  { %v739_v62 = vsel %vm727_vm0, %v731_v31, %v1994_v28  ;;  %v740_v63 = vsel %vm728_vm1, %v732_v32, %v1998_v29  ;;  %v456_v35 = vpop.f32.mrf.mxu0 }
 0x424   :  { %796 = vmatmul.f32.gmra.mxu2 %v739_v62  ;;  %825 = vmatmul.f32.gmra.mxu3 %v740_v63  ;;  %v486_v30 = vadd.f32 %v485_v1, %v456_v35  ;;  %v483_v62 = vadd.f32 %v482_v0, %v453_v59 }
 0x425   :  { %v1366_v36 = vpop.permute.xlu1 %1365 }
 0x426   :  { %v1368_v37 = vunpack.i.h.bf16 %v1366_v36  ;;  %v1367_v40 = vunpack.i.l.bf16 %v1366_v36 }
 0x428   :  { %v709_v43 = vsel %vm706_vm15, %v1367_v40, %v1368_v37  ;;  %v725_v44 = vsel %vm706_vm15, %v1368_v37, %v1367_v40  ;;  %v892_v37 = vld [vmem:[%s2218_s9] sm:$0xff]  ;;  %v893_v40 = vld [vmem:[%s2218_s9 + $0x8] sm:$0xff] }
 0x429   :  { %v733_v45 = vmax.f32 %v2034_v50, %v709_v43  ;;  %v734_v28 = vmax.f32 %v2039_v51, %v725_v44 }
 0x42b   :  { %v741_v29 = vsel %vm727_vm0, %v733_v45, %v2034_v50  ;;  %v742_v38 = vsel %vm728_vm1, %v734_v28, %v2039_v51  ;;  %v459_v4 = vpop.f32.mrf.mxu0  ;;  %v888_v28 = vld [vmem:[%s2217_s8] sm:$0xff] }
 0x42c   :  { %799 = vmatmul.f32.gmra.mxu2 %v741_v29  ;;  %828 = vmatmul.f32.gmra.mxu3 %v742_v38  ;;  %v489_v23 = vadd.f32 %v488_v6, %v459_v4  ;;  %v889_v29 = vld [vmem:[%s2217_s8 + $0x8] sm:$0xff]  ;;  %v890_v38 = vld [vmem:[%s2217_s8 + $0x10] sm:$0xff]  ;;  %s1446_s8 = smov 256  }
 0x433   :  { %v462_v5 = vpop.f32.mrf.mxu0 }
 0x434   :  { %802 = vmatmul.f32.gmra.mxu2 %v743_v53  ;;  %831 = vmatmul.f32.gmra.mxu3 %v744_v48  ;;  %v492_v20 = vadd.f32 %v491_v9, %v462_v5 }
 0x487   :  { %v794_v50 = vpop.f32.mrf.mxu2  ;;  %v823_v24 = vpop.f32.mrf.mxu3 }
 0x488   :  { %v824_v54 = vadd.f32 %v823_v24, %v794_v50  ;;  %v909_v24 = vpop.permute.xlu2 %908 }
 0x4a7   :  { %v797_v49 = vpop.f32.mrf.mxu2  ;;  %v826_v51 = vpop.f32.mrf.mxu3 }
 0x4a8   :  { %v827_v25 = vadd.f32 %v826_v51, %v797_v49 }
 0x4aa   :  { %v1379_v55 = vpack.i.bf16 %v824_v54, %v827_v25 }
 0x4ac   :  { %1380 = vrot.lane.b32.xlu1 %v1379_v55, %s1442_s5 }
 0x4af   :  { %v800_v56 = vpop.f32.mrf.mxu2  ;;  %v829_v57 = vpop.f32.mrf.mxu3 }
 0x4b0   :  { %v830_v58 = vadd.f32 %v829_v57, %v800_v56  ;;  %v1060_v56 = vld [vmem:[%s2212_s3 + $0x10] sm:$0xff]  ;;  %v1061_v57 = vld [vmem:[%s2212_s3 + $0x18] sm:$0xff] }
 0x4b1   :  { %1088 = vmatpush.msra.mxu2 %v1060_v56  ;;  %1117 = vmatpush.msra.mxu3 %v1061_v57 }
 0x4b4   :  { %903 = vperm.xlu1 %1386, %v893_v40  }
 0x4b7   :  { %v803_v60 = vpop.f32.mrf.mxu2  ;;  %v832_v14 = vpop.f32.mrf.mxu3 }
 0x4b8   :  { %v833_v61 = vadd.f32 %v832_v14, %v803_v60  ;;  %v1058_v60 = vld [vmem:[%s2212_s3] sm:$0xff]  ;;  %v1059_v14 = vld [vmem:[%s2212_s3 + $0x8] sm:$0xff] }
 0x4b9   :  { %1089 = vmatpush.msra.mxu2 %v1058_v60  ;;  %1118 = vmatpush.msra.mxu3 %v1059_v14 }
 0x4ba   :  { %v1374_v15 = vpack.i.bf16 %v830_v58, %v833_v61 }
 0x4bc   :  { %1375 = vrot.lane.b32.xlu0 %v1374_v15, %s1442_s5  ;;  %913 = vperm.xlu1 %1386, %v895_v41  }
 0x4c4   :  { %898 = vperm.xlu0 %1385, %v892_v37  }
 0x51e   :  { %v1381_v12 = vpop.permute.xlu1 %1380 }
 0x51f   :  { %v1382_v26 = vunpack.i.l.bf16 %v1381_v12  ;;  %v1383_v31 = vunpack.i.h.bf16 %v1381_v12 }
 0x521   :  { %v853_v63 = vsel %vm851_vm2, %v486_v30, %v1382_v26  ;;  %v852_v36 = vsel %vm851_vm2, %v483_v62, %v1383_v31 }
 0x526   :  { %v904_v53 = vpop.permute.xlu1 %903 }
 0x52e   :  { %v1376_v17 = vpop.permute.xlu0 %1375  ;;  %v914_v54 = vpop.permute.xlu1 %913 }
 0x52f   :  { %v1378_v21 = vunpack.i.h.bf16 %v1376_v17  ;;  %v1377_v22 = vunpack.i.l.bf16 %v1376_v17 }
 0x531   :  { %v855_v27 = vsel %vm851_vm2, %v492_v20, %v1377_v22  ;;  %v854_v32 = vsel %vm851_vm2, %v489_v23, %v1378_v21 }
 0x532   :  { %879 = vmatpush.msra.mxu0 %v855_v27 }
 0x534   :  { %880 = vmatpush.msra.mxu0 %v854_v32 }
 0x536   :  { %881 = vmatpush.msra.mxu0 %v853_v63  ;;  %v899_v46 = vpop.permute.xlu0 %898 }
 0x538   :  { %882 = vmatpush.msra.mxu0 %v852_v36 }
 0x539   :  { %1262 = vmatmul.msk.f32.vlgmr.msra.gmra.mxu0 %vm863_vm3, %v856_v33 }
 0x5b6   :  { %v884_v43 = vpop.f32.mrf.mxu0 }
 0x5b7   :  { %v885_v44 = vadd.f32 %v884_v43, %v861_v42 }
 0x5b9   :  { %v887_v45 = vmax.f32 %v885_v44, 0.0 }
 0x5bb   :  { %1263 = vmatpush.msk.msra.mxu1 %vm929_vm4, %v887_v45 }
 0x5bc   :  { %1264 = vmatmul.msk.f32.vlgmr.msra.gmra.mxu1 %vm916_vm5, %v888_v28 }
 0x5c4   :  { %1265 = vmatmul.msk.f32.gmra.mxu1 %vm916_vm5, %v889_v29 }
 0x5cc   :  { %1266 = vmatmul.msk.f32.gmra.mxu1 %vm916_vm5, %v890_v38 }
 0x5d4   :  { %1267 = vmatmul.msk.f32.gmra.mxu1 %vm916_vm5, %v891_v39 }
 0x639   :  { %v950_v47 = vpop.f32.mrf.mxu1 }
 0x63a   :  { %v951_v52 = vadd.f32 %v950_v47, %v899_v46 }
 0x63c   :  { %966 = vrot.lane.b32.xlu2 %v951_v52, %s1444_s24 }
 0x641   :  { %v953_v48 = vpop.f32.mrf.mxu1 }
 0x642   :  { %v954_v50 = vadd.f32 %v953_v48, %v904_v53 }
 0x644   :  { %968 = vrot.lane.b32.xlu0 %v954_v50, %s1444_s24 }
 0x649   :  { %v956_v49 = vpop.f32.mrf.mxu1 }
 0x64a   :  { %v957_v51 = vadd.f32 %v956_v49, %v909_v24 }
 0x64c   :  { %970 = vrot.lane.b32.xlu1 %v957_v51, %s1444_s24 }
 0x651   :  { %v959_v25 = vpop.f32.mrf.mxu1 }
 0x652   :  { %v960_v55 = vadd.f32 %v959_v25, %v914_v54 }
 0x654   :  { %972 = vrot.lane.b32.xlu2 %v960_v55, %s1444_s24 }
 0x696   :  { %v967_v58 = vpop.permute.xlu2 %966 }
 0x697   :  { %v978_v61 = vadd.f32 %v967_v58, %v951_v52 }
 0x699   :  { %v1268_v15 = vmul.f32 -1.442695, %v978_v61 }
 0x69b   :  { %1387 = vpow2.f32 %v1268_v15 }
 0x6a1   :  { %v1388_v59 = vpop.eup %1387 }
 0x6a2   :  { %v994_v0 = vadd.f32 1.0, %v1388_v59 }
 0x6a4   :  { %1389 = vrcp.f32 %v994_v0  ;;  %v1009_v2 = vand.u32 2147483648, %v994_v0  ;;  %v1007_v6 = vand.u32 2147483647, %v994_v0  ;;  %vm1003_vm7 = vweird.f32 %v994_v0 }
 0x6a6   :  { %v1010_v12 = vor.u32 1.1754944e-38, %v1009_v2  ;;  %vm1008_vm9 = vcmp.eq.f32.partialorder %v1007_v6, 8.507059e+37  ;;  %v1403_v2 = vld [vmem:[%s2209_s0] sm:$0xff] }
 0x6aa   :  { %v1390_v34 = vpop.eup %1389 }
 0x6ab   :  { %v999_v35 = vmul.f32 %v1390_v34, %v994_v0  ;;  %vm1004_vm6 = vweird.f32 %v1390_v34 }
 0x6ac   :  { %vm1005_vm8 = vmor %vm1003_vm7, %vm1004_vm6 }
 0x6ad   :  { %v1000_v1 = vsub.f32 1.0, %v999_v35 }
 0x6ae   :  { %v973_v3 = vpop.permute.xlu2 %972 }
 0x6af   :  { %v1001_v4 = vmul.f32 %v1390_v34, %v1000_v1  ;;  %v981_v9 = vadd.f32 %v973_v3, %v960_v55 }
 0x6b1   :  { %v1002_v5 = vadd.f32 %v1390_v34, %v1001_v4  ;;  %v1271_v21 = vmul.f32 -1.442695, %v981_v9  ;;  %v1404_v4 = vld [vmem:[%s2209_s0 + $0x8] sm:$0xff] }
 0x6b3   :  { %v1006_v17 = vsel %vm1005_vm8, %v1390_v34, %v1002_v5  ;;  %1391 = vpow2.f32 %v1271_v21 }
 0x6b4   :  { %v1011_v20 = vsel %vm1008_vm9, %v1010_v12, %v1006_v17 }
 0x6b5   :  { %1272 = vmatmul.msk.f32.vlgmr.msra.gmra.mxu2 %vm851_vm2, %v1011_v20  ;;  %1276 = vmatmul.msk.f32.vlgmr.msra.gmra.mxu3 %vm851_vm2, %v1011_v20  ;;  %v1405_v20 = vld [vmem:[%s2209_s0 + $0x10] sm:$0xff] }
 0x6b6   :  { %v969_v22 = vpop.permute.xlu0 %968 }
 0x6b7   :  { %v979_v23 = vadd.f32 %v969_v22, %v954_v50  ;;  %v1406_v22 = vld [vmem:[%s2209_s0 + $0x18] sm:$0xff] }
 0x6b9   :  { %v1269_v26 = vmul.f32 -1.442695, %v979_v23  ;;  %v1392_v31 = vpop.eup %1391 }
 0x6ba   :  { %v997_v33 = vadd.f32 1.0, %v1392_v31 }
 0x6bb   :  { %1393 = vpow2.f32 %v1269_v26 }
 0x6bc   :  { %v1054_v14 = vand.u32 2147483648, %v997_v33  ;;  %vm1048_vm4 = vweird.f32 %v997_v33  ;;  %v1052_v58 = vand.u32 2147483647, %v997_v33 }
 0x6be   :  { %v971_v27 = vpop.permute.xlu1 %970  ;;  %v1055_v15 = vor.u32 1.1754944e-38, %v1054_v14  ;;  %vm1053_vm6 = vcmp.eq.f32.partialorder %v1052_v58, 8.507059e+37 }
 0x6bf   :  { %v980_v30 = vadd.f32 %v971_v27, %v957_v51 }
 0x6c1   :  { %v1394_v32 = vpop.eup %1393  ;;  %v1270_v62 = vmul.f32 -1.442695, %v980_v30 }
 0x6c2   :  { %v995_v63 = vadd.f32 1.0, %v1394_v32  ;;  %v1407_v32 = vld [vmem:[%s2209_s0 + $0x20] sm:$0xff] }
 0x6c3   :  { %1395 = vpow2.f32 %v1270_v62 }
 0x6c4   :  { %1397 = vrcp.f32 %v995_v63  ;;  %v1024_v44 = vand.u32 2147483648, %v995_v63  ;;  %v1022_v28 = vand.u32 2147483647, %v995_v63  ;;  %vm1018_vm11 = vweird.f32 %v995_v63 }
 0x6c5   :  { %1399 = vrcp.f32 %v997_v33 }
 0x6c6   :  { %v1025_v46 = vor.u32 1.1754944e-38, %v1024_v44  ;;  %vm1023_vm13 = vcmp.eq.f32.partialorder %v1022_v28, 8.507059e+37  ;;  %v1410_v44 = vld [vmem:[%s2209_s0 + $0x38] sm:$0xff] }
 0x6c9   :  { %v1396_v36 = vpop.eup %1395 }
 0x6ca   :  { %v1398_v37 = vpop.eup %1397  ;;  %v996_v40 = vadd.f32 1.0, %v1396_v36 }
 0x6cb   :  { %v1014_v41 = vmul.f32 %v1398_v37, %v995_v63  ;;  %v1400_v43 = vpop.eup %1399  ;;  %vm1019_vm10 = vweird.f32 %v1398_v37  ;;  %v1408_v63 = vld [vmem:[%s2209_s0 + $0x28] sm:$0xff] }
 0x6cc   :  { %1401 = vrcp.f32 %v996_v40  ;;  %v1044_v38 = vmul.f32 %v1400_v43, %v997_v33  ;;  %vm1020_vm12 = vmor %vm1018_vm11, %vm1019_vm10  ;;  %v1039_v24 = vand.u32 2147483648, %v996_v40  ;;  %v1037_v51 = vand.u32 2147483647, %v996_v40 }
 0x6cd   :  { %v1015_v42 = vsub.f32 1.0, %v1014_v41  ;;  %vm1033_vm15 = vweird.f32 %v996_v40  ;;  %vm1049_vm3 = vweird.f32 %v1400_v43 }
 0x6ce   :  { %v1045_v50 = vsub.f32 1.0, %v1044_v38  ;;  %v1040_v55 = vor.u32 1.1754944e-38, %v1039_v24  ;;  %vm1038_vm1 = vcmp.eq.f32.partialorder %v1037_v51, 8.507059e+37  ;;  %vm1050_vm5 = vmor %vm1048_vm4, %vm1049_vm3 }
 0x6cf   :  { %v1016_v45 = vmul.f32 %v1398_v37, %v1015_v42  ;;  %v1409_v42 = vld [vmem:[%s2209_s0 + $0x30] sm:$0xff] }
 0x6d0   :  { %v1046_v25 = vmul.f32 %v1400_v43, %v1045_v50 }
 0x6d1   :  { %v1017_v29 = vadd.f32 %v1398_v37, %v1016_v45 }
 0x6d2   :  { %v1402_v39 = vpop.eup %1401  ;;  %v1047_v60 = vadd.f32 %v1400_v43, %v1046_v25 }
 0x6d3   :  { %v1021_v47 = vsel %vm1020_vm12, %v1398_v37, %v1017_v29  ;;  %v1029_v52 = vmul.f32 %v1402_v39, %v996_v40  ;;  %vm1034_vm14 = vweird.f32 %v1402_v39 }
 0x6d4   :  { %v1026_v53 = vsel %vm1023_vm13, %v1025_v46, %v1021_v47  ;;  %vm1035_vm0 = vmor %vm1033_vm15, %vm1034_vm14  ;;  %v1051_v61 = vsel %vm1050_vm5, %v1400_v43, %v1047_v60 }
 0x6d5   :  { %1273 = vmatmul.msk.f32.gmra.mxu2 %vm851_vm2, %v1026_v53  ;;  %1277 = vmatmul.msk.f32.gmra.mxu3 %vm851_vm2, %v1026_v53  ;;  %v1030_v48 = vsub.f32 1.0, %v1029_v52  ;;  %v1056_v59 = vsel %vm1053_vm6, %v1055_v15, %v1051_v61 }
 0x6d7   :  { %v1031_v49 = vmul.f32 %v1402_v39, %v1030_v48 }
 0x6d9   :  { %v1032_v54 = vadd.f32 %v1402_v39, %v1031_v49 }
 0x6db   :  { %v1036_v56 = vsel %vm1035_vm0, %v1402_v39, %v1032_v54 }
 0x6dc   :  { %v1041_v57 = vsel %vm1038_vm1, %v1040_v55, %v1036_v56 }
 0x6dd   :  { %1274 = vmatmul.msk.f32.gmra.mxu2 %vm851_vm2, %v1041_v57  ;;  %1278 = vmatmul.msk.f32.gmra.mxu3 %vm851_vm2, %v1041_v57 }
 0x6e5   :  { %1275 = vmatmul.msk.f32.gmra.mxu2 %vm851_vm2, %v1056_v59  ;;  %1279 = vmatmul.msk.f32.gmra.mxu3 %vm851_vm2, %v1056_v59 }
 0x738   :  { %v1091_v0 = vpop.f32.mrf.mxu2  ;;  %v1120_v34 = vpop.f32.mrf.mxu3 }
 0x739   :  { %v1132_v35 = vmul.f32 %v1091_v0, %v1803_v7  ;;  %v1133_v1 = vmul.f32 %v1120_v34, %v1805_v8 }
 0x73b   :  { %v1140_v3 = vadd.f32 %v1403_v2, %v1132_v35  ;;  %v1141_v6 = vadd.f32 %v1404_v4, %v1133_v1 }
 0x73d   :  { %v1148_v5 = vmax.f32 %v1140_v3, 0.0  ;;  %v1149_v9 = vmax.f32 %v1141_v6, 0.0 }
 0x73f   :  { %1156 = vst [vmem:[#allocation2] sm:$0xff] %v1148_v5 }
 0x740   :  { %1157 = vst [vmem:[#allocation2 + $0x8] sm:$0xff] %v1149_v9 }
 0x758   :  { %v1094_v12 = vpop.f32.mrf.mxu2  ;;  %v1123_v17 = vpop.f32.mrf.mxu3 }
 0x759   :  { %v1134_v7 = vmul.f32 %v1094_v12, %v1812_v10  ;;  %v1135_v8 = vmul.f32 %v1123_v17, %v1814_v11 }
 0x75b   :  { %v1142_v21 = vadd.f32 %v1405_v20, %v1134_v7  ;;  %v1143_v23 = vadd.f32 %v1406_v22, %v1135_v8 }
 0x75d   :  { %v1150_v26 = vmax.f32 %v1142_v21, 0.0  ;;  %v1151_v27 = vmax.f32 %v1143_v23, 0.0 }
 0x75f   :  { %1158 = vst [vmem:[#allocation2 + $0x10] sm:$0xff] %v1150_v26 }
 0x760   :  { %1159 = vst [vmem:[#allocation2 + $0x18] sm:$0xff] %v1151_v27  ;;  %v1097_v30 = vpop.f32.mrf.mxu2  ;;  %v1126_v31 = vpop.f32.mrf.mxu3 }
 0x761   :  { %v1136_v10 = vmul.f32 %v1097_v30, %v1821_v13  ;;  %v1137_v11 = vmul.f32 %v1126_v31, %v1823_v16 }
 0x763   :  { %v1144_v62 = vadd.f32 %v1407_v32, %v1136_v10  ;;  %v1145_v33 = vadd.f32 %v1408_v63, %v1137_v11 }
 0x765   :  { %v1152_v36 = vmax.f32 %v1144_v62, 0.0  ;;  %v1153_v37 = vmax.f32 %v1145_v33, 0.0 }
 0x767   :  { %1160 = vst [vmem:[#allocation2 + $0x20] sm:$0xff] %v1152_v36 }
 0x768   :  { %1161 = vst [vmem:[#allocation2 + $0x28] sm:$0xff] %v1153_v37  ;;  %v1100_v40 = vpop.f32.mrf.mxu2  ;;  %v1129_v41 = vpop.f32.mrf.mxu3 }
 0x769   :  { %v1138_v13 = vmul.f32 %v1100_v40, %v1830_v18  ;;  %v1139_v16 = vmul.f32 %v1129_v41, %v1832_v19 }
 0x76b   :  { %v1146_v43 = vadd.f32 %v1409_v42, %v1138_v13  ;;  %v1147_v45 = vadd.f32 %v1410_v44, %v1139_v16 }
 0x76d   :  { %v1154_v28 = vmax.f32 %v1146_v43, 0.0  ;;  %v1155_v18 = vmax.f32 %v1147_v45, 0.0 }
 0x76f   :  { %1162 = vst [vmem:[#allocation2 + $0x30] sm:$0xff] %v1154_v28 }
 0x770   :  { %1163 = vst [vmem:[#allocation2 + $0x38] sm:$0xff] %v1155_v18 }
 0x771   :  { %1176 = dma.vmem_to_hbm [thread:$0]  %s1169_s1, 1024, %s1171_s25, [#allocation3], %s1446_s8, %s1446_s8, %s1442_s5  }
 0x772   :  { %1435 = dma.done.wait [#allocation3], 1024  }
 0x773   :  { %1436 = vsyncadd [#allocation3], 4294966272 }
 0x774   :  { %1181 = vsyncpa [#allocation3], 1 }

</bundles_post_ra>
